<compile_context>
chip_gen: v5e
topology: v5e:2x2
jax: 0.10.0
libtpu: 0.0.40
codegen_flags: <defaults>
</compile_context>

<pallas_src>
import jax
import jax.numpy as jnp
from jax.experimental import pallas as pl
from jax.experimental.pallas import tpu as pltpu


HIDDEN = (128, 256, 512)
OUT_REAL = 784                      # 28 * 28
OUT_PAD = 896                       # 7 * 128 (lane-dense output width)


def _round_up(x, m):
    return ((x + m - 1) // m) * m


def _cdiv(a, b):
    return -(-a // b)


def _pick_tile_b(batch, max_tile=1024):
    """Batch tile: big (amortise per-step overhead), low padding waste, and
    >= 2 grid steps when B >= 256 so both v7x TensorCores are used."""
    n_tiles = _cdiv(batch, max_tile)
    if n_tiles == 1 and batch >= 256:
        n_tiles = 2
    return max(16, _round_up(_cdiv(batch, n_tiles), 16))


# ----------------------------------------------------------------------------
# Kernel: fused (embedding-bias select) + 4-layer MLP for one batch tile.
# Weights / tables use constant index_maps -> DMA'd once, VMEM-resident.
# ----------------------------------------------------------------------------
def _generator_mlp_kernel(
    z_ref,            # (TILE_B, z_dim)   bf16
    lbl_ref,          # (TILE_B, 1)       int32
    cls_ref,          # (NC_PAD, 128)     f32   label_emb @ W1_emb + b1
    w1_ref,           # (z_dim, 128)      bf16  W1 rows for z
    w2_ref, b2_ref,   # (128, 256) bf16, (1, 256) f32
    w3_ref, b3_ref,   # (256, 512) bf16, (1, 512) f32
    w4_ref, b4_ref,   # (512, 896) bf16, (1, 896) f32 (zero-padded cols)
    o_ref,            # (TILE_B, 896)     bf16
):
    tile_b = z_ref.shape[0]
    nc_pad = cls_ref.shape[0]

    # One-hot select of the per-class layer-1 bias (tiny MXU matmul, exact).
    lbl = lbl_ref[...]                                               # (TILE_B, 1)
    classes = jax.lax.broadcasted_iota(jnp.int32, (tile_b, nc_pad), 1)
    onehot = (lbl == classes).astype(jnp.float32)                    # (TILE_B, NC_PAD)
    cls_bias = jnp.dot(onehot, cls_ref[...],
                       preferred_element_type=jnp.float32)           # (TILE_B, 128)

    # Layer 1: z @ W1_z + (label_emb @ W1_emb + b1)[label]
    h = jnp.dot(z_ref[...], w1_ref[...],
                preferred_element_type=jnp.float32) + cls_bias
    h = jnp.maximum(h, 0.0).astype(jnp.bfloat16)

    h = jnp.dot(h, w2_ref[...], preferred_element_type=jnp.float32) + b2_ref[...]
    h = jnp.maximum(h, 0.0).astype(jnp.bfloat16)

    h = jnp.dot(h, w3_ref[...], preferred_element_type=jnp.float32) + b3_ref[...]
    h = jnp.maximum(h, 0.0).astype(jnp.bfloat16)

    h = jnp.dot(h, w4_ref[...], preferred_element_type=jnp.float32) + b4_ref[...]
    # Tanh in f32 (safe on v5e's EUP), downcast merged into the bf16 store.
    o_ref[...] = jnp.tanh(h).astype(jnp.bfloat16)


def generator_mlp(z, labels_2d, packed, *, tile_b=None):
    """z: (B, z_dim) bf16, labels_2d: (B, 1) int32.  Returns (B, OUT_PAD) bf16."""
    B, z_dim = z.shape
    cls_tbl, w1, w2, b2, w3, b3, w4, b4 = packed

    z = z.astype(jnp.bfloat16)
    labels_2d = labels_2d.astype(jnp.int32)

    if tile_b is None:
        tile_b = _pick_tile_b(B)
    tile_b = max(16, _round_up(tile_b, 16))
    n_tiles = _cdiv(B, tile_b)
    b_pad = n_tiles * tile_b
    if b_pad != B:
        z = jnp.pad(z, ((0, b_pad - B), (0, 0)))
        labels_2d = jnp.pad(labels_2d, ((0, b_pad - B), (0, 0)))

    const_args = (cls_tbl, w1, w2, b2, w3, b3, w4, b4)

    def _const(i):                                  # resident across grid steps
        return (0, 0)

    in_specs = [
        pl.BlockSpec((tile_b, z_dim), lambda i: (i, 0)),
        pl.BlockSpec((tile_b, 1), lambda i: (i, 0)),
    ] + [pl.BlockSpec(a.shape, _const) for a in const_args]
    out_spec = pl.BlockSpec((tile_b, OUT_PAD), lambda i: (i, 0))

    nc_pad = cls_tbl.shape[0]
    mm_flops = 2 * b_pad * (z_dim * HIDDEN[0] + nc_pad * HIDDEN[0]
                            + HIDDEN[0] * HIDDEN[1]
                            + HIDDEN[1] * HIDDEN[2]
                            + HIDDEN[2] * OUT_PAD)
    bytes_accessed = int(
        z.size * 2 + labels_2d.size * 4
        + sum(int(a.size) * a.dtype.itemsize for a in const_args)
        + b_pad * OUT_PAD * 2
    )
    cost = pl.CostEstimate(flops=int(mm_flops),
                           transcendentals=int(b_pad * OUT_PAD),
                           bytes_accessed=bytes_accessed)

    out = pl.pallas_call(
        _generator_mlp_kernel,
        out_shape=jax.ShapeDtypeStruct((b_pad, OUT_PAD), jnp.bfloat16),
        grid=(n_tiles,),
        in_specs=in_specs,
        out_specs=out_spec,
        compiler_params=pltpu.CompilerParams(
            dimension_semantics=("parallel",),
            vmem_limit_bytes=32 * 1024 * 1024),
        cost_estimate=cost,
    )(z, labels_2d, *const_args)

    return out[:B]


# ----------------------------------------------------------------------------
# Parameter construction (f32, nn.Linear / nn.Embedding-style init) and
# packing into kernel layout (bf16 weights, fused per-class layer-1 table).
# ----------------------------------------------------------------------------
def init_params(key, z_dim, embed_dim, num_classes):
    in_dim = z_dim + embed_dim
    dims = [in_dim, HIDDEN[0], HIDDEN[1], HIDDEN[2], OUT_REAL]
    keys = jax.random.split(key, 2 * len(dims))

    label_emb = jax.random.normal(keys[0], (num_classes, embed_dim), jnp.float32)

    layers = []
    for i in range(4):
        fan_in, fan_out = dims[i], dims[i + 1]
        bound = 1.0 / jnp.sqrt(fan_in)
        w = jax.random.uniform(keys[2 * i + 1], (fan_in, fan_out),
                               jnp.float32, -bound, bound)
        b = jax.random.uniform(keys[2 * i + 2], (1, fan_out),
                               jnp.float32, -bound, bound)
        layers.append((w, b))
    return label_emb, tuple(layers)


def pack_params(label_emb, layers, z_dim):
    (w1, b1), (w2, b2), (w3, b3), (w4, b4) = layers
    num_classes = label_emb.shape[0]
    nc_pad = max(8, _round_up(num_classes, 8))

    # Per-class layer-1 contribution (exact f32 precompute, stays tiny).
    cls_tbl = jnp.dot(label_emb, w1[z_dim:, :]) + b1            # (NC, 128)
    cls_tbl = jnp.pad(cls_tbl, ((0, nc_pad - num_classes), (0, 0)))

    w1z = w1[:z_dim, :].astype(jnp.bfloat16)                    # (z_dim, 128)
    w4p = jnp.pad(w4, ((0, 0), (0, OUT_PAD - OUT_REAL))).astype(jnp.bfloat16)
    b4p = jnp.pad(b4, ((0, 0), (0, OUT_PAD - OUT_REAL)))

    return (cls_tbl, w1z,
            w2.astype(jnp.bfloat16), b2,
            w3.astype(jnp.bfloat16), b3,
            w4p, b4p)


# ----------------------------------------------------------------------------
# Full forward pass (equivalent to NaiveGenerator.forward).
# ----------------------------------------------------------------------------
def naive_generator_forward(z, labels, packed, *, tile_b=None,
                            out_dtype=jnp.float32):
    """z: (B, z_dim), labels: (B,) int  ->  (B, 1, 28, 28) out_dtype."""
    B = z.shape[0]
    out = generator_mlp(z.astype(jnp.bfloat16),
                        labels.reshape(B, 1).astype(jnp.int32),
                        packed, tile_b=tile_b)                   # (B, 896) bf16
    out = out[:, :OUT_REAL].astype(out_dtype)                    # slice on bf16
    return out.reshape(B, 1, 28, 28)


# ----------------------------------------------------------------------------
# Demo / smoke test
# ----------------------------------------------------------------------------
if __name__ == "__main__":
    z_dim, embed_dim, num_classes = 32, 16, 10
    batch = 32
    demo_tile_b = 16     # 2 grid steps -> exercises batch grid + resident weights

    key = jax.random.PRNGKey(0)
    k_param, k_z, k_lbl = jax.random.split(key, 3)

    label_emb, layers = init_params(k_param, z_dim, embed_dim, num_classes)
    packed = pack_params(label_emb, layers, z_dim)

    z = jax.random.normal(k_z, (batch, z_dim), jnp.float32)
    labels = jax.random.randint(k_lbl, (batch,), 0, num_classes, jnp.int32)

    fwd = jax.jit(lambda zz, ll: naive_generator_forward(
        zz, ll, packed, tile_b=demo_tile_b))
    imgs = fwd(z, labels)
    jax.block_until_ready(imgs)

    # Pure-f32 reference of the original module math (validates that bf16
    # weight quantisation is the only deviation from the PyTorch module).
    x = jnp.concatenate([z, label_emb[labels]], axis=1)
    h = x
    for i, (w, b) in enumerate(layers):
        h = jnp.dot(h, w) + b
        h = jnp.maximum(h, 0.0) if i < 3 else jnp.tanh(h)
    ref = h.reshape(batch, 1, 28, 28)

    assert imgs.shape == (batch, 1, 28, 28)
    max_err = float(jnp.max(jnp.abs(imgs - ref)))
    assert max_err < 5e-2, f"max abs err vs f32 reference: {max_err}"
    print("KERNEL_OK")
</pallas_src>

<mosaic_0001>
module attributes {stable_mosaic.version = 11 : i64} {
  func.func @_generator_mlp_kernel(%arg0: i32, %arg1: memref<16x32xbf16, #tpu.memory_space<vmem>>, %arg2: memref<16x1xi32, #tpu.memory_space<vmem>>, %arg3: memref<16x128xf32, #tpu.memory_space<vmem>>, %arg4: memref<32x128xbf16, #tpu.memory_space<vmem>>, %arg5: memref<128x256xbf16, #tpu.memory_space<vmem>>, %arg6: memref<1x256xf32, #tpu.memory_space<vmem>>, %arg7: memref<256x512xbf16, #tpu.memory_space<vmem>>, %arg8: memref<1x512xf32, #tpu.memory_space<vmem>>, %arg9: memref<512x896xbf16, #tpu.memory_space<vmem>>, %arg10: memref<1x896xf32, #tpu.memory_space<vmem>>, %arg11: memref<16x896xbf16, #tpu.memory_space<vmem>>) attributes {dimension_semantics = [#tpu.dimension_semantics<parallel>], iteration_bounds = array<i64: 2>, scalar_prefetch = 0 : i64, scratch_operands = 0 : i64, tpu.core_type = #tpu.core_type<tc>, window_params = [{transform_indices = @transform_0, window_bounds = array<i64: 16, 32>}, {transform_indices = @transform_1, window_bounds = array<i64: 16, 1>}, {pipeline_mode = #tpu.pipeline_mode<synchronous>, transform_indices = @transform_2, window_bounds = array<i64: 16, 128>}, {pipeline_mode = #tpu.pipeline_mode<synchronous>, transform_indices = @transform_3, window_bounds = array<i64: 32, 128>}, {pipeline_mode = #tpu.pipeline_mode<synchronous>, transform_indices = @transform_4, window_bounds = array<i64: 128, 256>}, {pipeline_mode = #tpu.pipeline_mode<synchronous>, transform_indices = @transform_5, window_bounds = array<i64: 1, 256>}, {pipeline_mode = #tpu.pipeline_mode<synchronous>, transform_indices = @transform_6, window_bounds = array<i64: 256, 512>}, {pipeline_mode = #tpu.pipeline_mode<synchronous>, transform_indices = @transform_7, window_bounds = array<i64: 1, 512>}, {pipeline_mode = #tpu.pipeline_mode<synchronous>, transform_indices = @transform_8, window_bounds = array<i64: 512, 896>}, {pipeline_mode = #tpu.pipeline_mode<synchronous>, transform_indices = @transform_9, window_bounds = array<i64: 1, 896>}, {transform_indices = @transform_10, window_bounds = array<i64: 16, 896>}]} {
    %c0 = arith.constant 0 : index
    %c0_0 = arith.constant 0 : index
    %0 = vector.load %arg2[%c0, %c0_0] : memref<16x1xi32, #tpu.memory_space<vmem>>, vector<16x1xi32>
    %1 = tpu.iota {dimensions = array<i32: 1>} : vector<16x16xi32>
    %2 = vector.broadcast %0 : vector<16x1xi32> to vector<16x16xi32>
    %3 = arith.cmpi eq, %2, %1 : vector<16x16xi32>
    %4 = arith.extui %3 : vector<16x16xi1> to vector<16x16xi32>
    %5 = arith.sitofp %4 : vector<16x16xi32> to vector<16x16xf32>
    %c0_1 = arith.constant 0 : index
    %c0_2 = arith.constant 0 : index
    %6 = vector.load %arg3[%c0_1, %c0_2] : memref<16x128xf32, #tpu.memory_space<vmem>>, vector<16x128xf32>
    %cst = arith.constant dense<0.000000e+00> : vector<16x128xf32>
    %7 = tpu.matmul %5, %6, %cst {dimension_numbers = #tpu.dot_dimension_numbers<[1], [0], [0], [1], [0, 0, 1, 1], [], []>} : vector<16x16xf32>, vector<16x128xf32>, vector<16x128xf32> -> vector<16x128xf32>
    %c0_3 = arith.constant 0 : index
    %c0_4 = arith.constant 0 : index
    %8 = vector.load %arg1[%c0_3, %c0_4] : memref<16x32xbf16, #tpu.memory_space<vmem>>, vector<16x32xbf16>
    %c0_5 = arith.constant 0 : index
    %c0_6 = arith.constant 0 : index
    %9 = vector.load %arg4[%c0_5, %c0_6] : memref<32x128xbf16, #tpu.memory_space<vmem>>, vector<32x128xbf16>
    %cst_7 = arith.constant dense<0.000000e+00> : vector<16x128xf32>
    %10 = tpu.matmul %8, %9, %cst_7 {dimension_numbers = #tpu.dot_dimension_numbers<[1], [0], [0], [1], [0, 0, 1, 1], [], []>} : vector<16x32xbf16>, vector<32x128xbf16>, vector<16x128xf32> -> vector<16x128xf32>
    %11 = arith.addf %10, %7 : vector<16x128xf32>
    %cst_8 = arith.constant 0.000000e+00 : f32
    %12 = vector.broadcast %cst_8 : f32 to vector<16x128xf32>
    %13 = arith.maximumf %11, %12 : vector<16x128xf32>
    %14 = arith.truncf %13 : vector<16x128xf32> to vector<16x128xbf16>
    %c0_9 = arith.constant 0 : index
    %c0_10 = arith.constant 0 : index
    %15 = vector.load %arg5[%c0_9, %c0_10] : memref<128x256xbf16, #tpu.memory_space<vmem>>, vector<128x256xbf16>
    %cst_11 = arith.constant dense<0.000000e+00> : vector<16x256xf32>
    %16 = tpu.matmul %14, %15, %cst_11 {dimension_numbers = #tpu.dot_dimension_numbers<[1], [0], [0], [1], [0, 0, 1, 1], [], []>} : vector<16x128xbf16>, vector<128x256xbf16>, vector<16x256xf32> -> vector<16x256xf32>
    %c0_12 = arith.constant 0 : index
    %c0_13 = arith.constant 0 : index
    %17 = vector.load %arg6[%c0_12, %c0_13] : memref<1x256xf32, #tpu.memory_space<vmem>>, vector<1x256xf32>
    %18 = vector.broadcast %17 : vector<1x256xf32> to vector<16x256xf32>
    %19 = arith.addf %16, %18 : vector<16x256xf32>
    %cst_14 = arith.constant 0.000000e+00 : f32
    %20 = vector.broadcast %cst_14 : f32 to vector<16x256xf32>
    %21 = arith.maximumf %19, %20 : vector<16x256xf32>
    %22 = arith.truncf %21 : vector<16x256xf32> to vector<16x256xbf16>
    %c0_15 = arith.constant 0 : index
    %c0_16 = arith.constant 0 : index
    %23 = vector.load %arg7[%c0_15, %c0_16] : memref<256x512xbf16, #tpu.memory_space<vmem>>, vector<256x512xbf16>
    %cst_17 = arith.constant dense<0.000000e+00> : vector<16x512xf32>
    %24 = tpu.matmul %22, %23, %cst_17 {dimension_numbers = #tpu.dot_dimension_numbers<[1], [0], [0], [1], [0, 0, 1, 1], [], []>} : vector<16x256xbf16>, vector<256x512xbf16>, vector<16x512xf32> -> vector<16x512xf32>
    %c0_18 = arith.constant 0 : index
    %c0_19 = arith.constant 0 : index
    %25 = vector.load %arg8[%c0_18, %c0_19] : memref<1x512xf32, #tpu.memory_space<vmem>>, vector<1x512xf32>
    %26 = vector.broadcast %25 : vector<1x512xf32> to vector<16x512xf32>
    %27 = arith.addf %24, %26 : vector<16x512xf32>
    %cst_20 = arith.constant 0.000000e+00 : f32
    %28 = vector.broadcast %cst_20 : f32 to vector<16x512xf32>
    %29 = arith.maximumf %27, %28 : vector<16x512xf32>
    %30 = arith.truncf %29 : vector<16x512xf32> to vector<16x512xbf16>
    %c0_21 = arith.constant 0 : index
    %c0_22 = arith.constant 0 : index
    %31 = vector.load %arg9[%c0_21, %c0_22] : memref<512x896xbf16, #tpu.memory_space<vmem>>, vector<512x896xbf16>
    %cst_23 = arith.constant dense<0.000000e+00> : vector<16x896xf32>
    %32 = tpu.matmul %30, %31, %cst_23 {dimension_numbers = #tpu.dot_dimension_numbers<[1], [0], [0], [1], [0, 0, 1, 1], [], []>} : vector<16x512xbf16>, vector<512x896xbf16>, vector<16x896xf32> -> vector<16x896xf32>
    %c0_24 = arith.constant 0 : index
    %c0_25 = arith.constant 0 : index
    %33 = vector.load %arg10[%c0_24, %c0_25] : memref<1x896xf32, #tpu.memory_space<vmem>>, vector<1x896xf32>
    %34 = vector.broadcast %33 : vector<1x896xf32> to vector<16x896xf32>
    %35 = arith.addf %32, %34 : vector<16x896xf32>
    %36 = math.tanh %35 : vector<16x896xf32>
    %37 = arith.truncf %36 : vector<16x896xf32> to vector<16x896xbf16>
    %c0_26 = arith.constant 0 : index
    %c0_27 = arith.constant 0 : index
    %38 = vector.load %arg11[%c0_26, %c0_27] : memref<16x896xbf16, #tpu.memory_space<vmem>>, vector<16x896xbf16>
    tpu.vector_store %arg11[%c0_26, %c0_27], %37 {strides = array<i32>} : memref<16x896xbf16, #tpu.memory_space<vmem>>, vector<16x896xbf16>,
    return
  }
  func.func @transform_0(%arg0: i32) -> (i32, i32) {
    %c0_i32 = arith.constant 0 : i32
    %c0_i32_0 = arith.constant 0 : i32
    return %arg0, %c0_i32 : i32, i32
  }
  func.func @transform_1(%arg0: i32) -> (i32, i32) {
    %c0_i32 = arith.constant 0 : i32
    %c0_i32_0 = arith.constant 0 : i32
    return %arg0, %c0_i32 : i32, i32
  }
  func.func @transform_2(%arg0: i32) -> (i32, i32) {
    %c0_i32 = arith.constant 0 : i32
    %c0_i32_0 = arith.constant 0 : i32
    %c0_i32_1 = arith.constant 0 : i32
    return %c0_i32, %c0_i32_0 : i32, i32
  }
  func.func @transform_3(%arg0: i32) -> (i32, i32) {
    %c0_i32 = arith.constant 0 : i32
    %c0_i32_0 = arith.constant 0 : i32
    %c0_i32_1 = arith.constant 0 : i32
    return %c0_i32, %c0_i32_0 : i32, i32
  }
  func.func @transform_4(%arg0: i32) -> (i32, i32) {
    %c0_i32 = arith.constant 0 : i32
    %c0_i32_0 = arith.constant 0 : i32
    %c0_i32_1 = arith.constant 0 : i32
    return %c0_i32, %c0_i32_0 : i32, i32
  }
  func.func @transform_5(%arg0: i32) -> (i32, i32) {
    %c0_i32 = arith.constant 0 : i32
    %c0_i32_0 = arith.constant 0 : i32
    %c0_i32_1 = arith.constant 0 : i32
    return %c0_i32, %c0_i32_0 : i32, i32
  }
  func.func @transform_6(%arg0: i32) -> (i32, i32) {
    %c0_i32 = arith.constant 0 : i32
    %c0_i32_0 = arith.constant 0 : i32
    %c0_i32_1 = arith.constant 0 : i32
    return %c0_i32, %c0_i32_0 : i32, i32
  }
  func.func @transform_7(%arg0: i32) -> (i32, i32) {
    %c0_i32 = arith.constant 0 : i32
    %c0_i32_0 = arith.constant 0 : i32
    %c0_i32_1 = arith.constant 0 : i32
    return %c0_i32, %c0_i32_0 : i32, i32
  }
  func.func @transform_8(%arg0: i32) -> (i32, i32) {
    %c0_i32 = arith.constant 0 : i32
    %c0_i32_0 = arith.constant 0 : i32
    %c0_i32_1 = arith.constant 0 : i32
    return %c0_i32, %c0_i32_0 : i32, i32
  }
  func.func @transform_9(%arg0: i32) -> (i32, i32) {
    %c0_i32 = arith.constant 0 : i32
    %c0_i32_0 = arith.constant 0 : i32
    %c0_i32_1 = arith.constant 0 : i32
    return %c0_i32, %c0_i32_0 : i32, i32
  }
  func.func @transform_10(%arg0: i32) -> (i32, i32) {
    %c0_i32 = arith.constant 0 : i32
    %c0_i32_0 = arith.constant 0 : i32
    return %arg0, %c0_i32 : i32, i32
  }
}

</mosaic_0001>

<bundles_post_ra>
// kernel: _lambda_.1
= control target key start
LH: loop header
LB: loop body
LE: loop exit
PB: predicated region body
PF: predicated region fallthrough
CT: control target
= control target key end

     0   :  { %15 = vsyncpa [#allocation3], 0  ;;  %s5109_s0 = inlined_call_operand.vmem [shape: bf16[32,32], index: 0, kind: input, shape index: {}]   ;;  %s5110_s1 = inlined_call_operand.vmem [shape: s32[32,1], index: 1, kind: input, shape index: {}]   ;;  %s5111_s2 = inlined_call_operand.vmem [shape: f32[16,128], index: 2, kind: input, shape index: {}]   ;;  %s5112_s3 = inlined_call_operand.vmem [shape: bf16[32,128], index: 3, kind: input, shape index: {}]   ;;  %s5113_s4 = inlined_call_operand.hbm [shape: bf16[128,256], index: 4, kind: input, shape index: {}]   ;;  %s5114_s5 = inlined_call_operand.vmem [shape: f32[1,256], index: 5, kind: input, shape index: {}]   ;;  %s5115_s6 = inlined_call_operand.hbm [shape: bf16[256,512], index: 6, kind: input, shape index: {}]   ;;  %s5116_s7 = inlined_call_operand.vmem [shape: f32[1,512], index: 7, kind: input, shape index: {}]   ;;  %s5117_s8 = inlined_call_operand.hbm [shape: bf16[512,896], index: 8, kind: input, shape index: {}]   ;;  %s5118_s9 = inlined_call_operand.vmem [shape: f32[1,896], index: 9, kind: input, shape index: {}]   ;;  %s5119_s10 = inlined_call_operand.vmem [shape: bf16[32,896], index: 10, kind: output, shape index: {}]  }
   0x1   :  { %16 = vsyncpa [#allocation5], 0  ;;  %s4939_s13 = smov 0  }
   0x2 LB: > { %s307_s16 = sshll.u32 %s5115_s6, 4  ;;  %s5120_s17 = sadd.s32 4294967295, %s4871_s13   ;;  %s4871_s13 = sphi %s4939_s13, %s22_s13   ;;  %s308_s16 = int_to_ptr.hbm [resolvable:$true] %s307_s16 }
   0x3   : > { %p3133_p0 = scmp.ge.s32.totalorder %s4871_s13, 1  ;;  %p273_p1 = scmp.lt.s32.totalorder %s4871_s13, 3 }
   0x4   : > { %p4952_p2 = scmp.eq.s32.totalorder %s5120_s17, 0  ;;  %s4873_s20 = smov [#allocation4]  }
   0x5   : > { %p4956_p3 = pnand %p3133_p0, %p273_p1  ;;  %s309_s21 = sshll.u32 %s4873_s20, 4  ;;  %s310_s21 = int_to_ptr.vmem [resolvable:$true] %s309_s21 }
   0x6   : > { %s290_s24 = sshll.u32 %s5113_s4, 4  ;;  %s4874_s26 = smov [#allocation2]   ;;  %s291_s24 = int_to_ptr.hbm [resolvable:$true] %s290_s24 }
   0x7   : > { %p4703_p4 = pneg %p4956_p3  ;;  %s292_s27 = sshll.u32 %s4874_s26, 4  ;;  %s293_s27 = int_to_ptr.vmem [resolvable:$true] %s292_s27 }
   0x8   : > { %s4875_s28 = smov 256   ;;  %s4876_s29 = smov 16  }
   0x9   : > { %p4967_p5 = pnand %p4952_p2, %p4703_p4  ;;  %s324_s12 = sshll.u32 %s5117_s8, 4  ;;  %s325_s12 = int_to_ptr.hbm [resolvable:$true] %s324_s12 }
   0xa   : > { %s4877_s14 = smov 128   ;;  %s4878_s15 = smov 8  }
   0xb   : > { %4709 = dma.hbm_to_vmem [thread:$0]  (!%p4967_p5), %s308_s16, 8192, %s310_s21, [#allocation5], %s4875_s28, %s4875_s28, %s4876_s29  }
   0xc   : > { %4706 = dma.hbm_to_vmem [thread:$0]  (!%p4967_p5), %s291_s24, 2048, %s293_s27, [#allocation3], %s4877_s14, %s4877_s14, %s4878_s15  }
   0xd   : > { %s4879_s20 = smov [#allocation6]   ;;  %s4880_s23 = smov 448  }
   0xe   : > { %s326_s22 = sshll.u32 %s4879_s20, 4  ;;  %s4881_s17 = smov 28   ;;  %s327_s22 = int_to_ptr.vmem [resolvable:$true] %s326_s22 }
   0xf   : > { %4712 = dma.hbm_to_vmem [thread:$0]  (!%p4967_p5), %s325_s12, 28672, %s327_s22, [#allocation5], %s4880_s23, %s4880_s23, %s4881_s17  }
  0x10   : > { %363 = sbr.rel (%p4956_p3) target bundleno = 912 (0x390), region = 60 }
  0x15   : > { %4862 = dma.done.wait (%p4952_p2), [#allocation3], 2048  }
  0x16   : > { %4864 = vsyncadd (%p4952_p2), [#allocation3], 4294965248 }
  0x17   : > { %4866 = dma.done.wait (%p4952_p2), [#allocation5], 36864  }
  0x18   : > { %4868 = vsyncadd (%p4952_p2), [#allocation5], 4294930432  ;;  %s5124_s16 = sadd.s32 4294967295, %s4871_s13   ;;  %v4882_v0 = vmov 0   ;;  %v4385_v2 = vld [vmem:[%s5112_s3 + $0x8] sm:$0xff]  ;;  %v4384_v4 = vld [vmem:[%s5112_s3] sm:$0xff]  ;;  %v440_v32 = vlaneseq }
  0x19   : > { %s3142_s21 = sshll.u32 %s5124_s16, 1  ;;  %4738 = vset.pattern.permute.xlu0 %v4882_v0  ;;  %v455_v3 = vld [vmem:[%s5111_s2 + $0x8] sm:$0xff]  ;;  %519 = vmatpush.bf16.msra.mxu1 %v4385_v2  ;;  %vm509_vm0 = vcmask 261120   ;;  %v454_v7 = vld [vmem:[%s5111_s2] sm:$0xff]  ;;  %v3223_v8 = vld [vmem:[#allocation2 + $0x70] sm:$0xf] }
  0x1a   : > { %p419_p6 = scmp.lt.s32.totalorder %s3142_s21, 3  ;;  %477 = vmatpush.msra.mxu0 %v455_v3  ;;  %v4401_v9 = vld [vmem:[#allocation2 + $0x74] sm:$0xf0]  ;;  %v4400_v10 = vld [vmem:[#allocation2 + $0x74] sm:$0xf]  ;;  %v441_v33 = vand.u32 127, %v440_v32 }
  0x1b   : > { %v3224_v11 = vor.u32 %v4401_v9, %v3223_v8  ;;  %v3225_v12 = vld [vmem:[#allocation2 + $0x78] sm:$0xf0]  ;;  %v3215_v13 = vld [vmem:[#allocation2 + $0x60] sm:$0xf]  ;;  %v4399_v14 = vld [vmem:[#allocation2 + $0x64] sm:$0xf0] }
  0x1c   : > { %s5126_s21 = smov (!%p419_p6, %s3142_s21), 3  ;;  %478 = vmatpush.msra.mxu0 %v454_v7  ;;  %v3228_v15 = vor.u32 %v4400_v10, %v3225_v12  ;;  %v4398_v16 = vld [vmem:[#allocation2 + $0x64] sm:$0xf]  ;;  %v3217_v17 = vld [vmem:[#allocation2 + $0x68] sm:$0xf0]  ;;  %v3216_v18 = vor.u32 %v4399_v14, %v3215_v13  ;;  %vm456_vm1 = vcmask 130048  }
  0x1d   : > { %s3145_s17 = sshll.u32 %s5126_s21, 3  ;;  %s3143_s26 = sshll.u32 %s5126_s21, 2  ;;  %520 = vmatpush.bf16.msra.mxu1 %v4384_v4  ;;  %632 = vmatpush.bf16.msra.mxu2 %v3224_v11  ;;  %v3220_v19 = vor.u32 %v4398_v16, %v3217_v17  ;;  %v3207_v20 = vld [vmem:[#allocation2 + $0x50] sm:$0xf]  ;;  %v4397_v21 = vld [vmem:[#allocation2 + $0x54] sm:$0xf0] }
  0x1e   : > { %s428_s25 = scalar_lea.vmem %s5110_s1, %s3145_s17  ;;  %s422_s15 = scalar_lea.vmem %s5109_s0, %s3143_s26  ;;  %646 = vmatpush.bf16.msra.mxu3 %v3228_v15  ;;  %v4396_v22 = vld [vmem:[#allocation2 + $0x54] sm:$0xf]  ;;  %v3208_v23 = vor.u32 %v4397_v21, %v3207_v20  ;;  %v3209_v24 = vld [vmem:[#allocation2 + $0x58] sm:$0xf0]  ;;  %v3199_v25 = vld [vmem:[#allocation2 + $0x40] sm:$0xf] }
  0x1f   : > { %v438_v1 = vld [vmem:[%s428_s25] sm:$0xff]  ;;  %v439_v6 = vld [vmem:[%s428_s25 + $0x8] sm:$0xff]  ;;  %v3212_v27 = vor.u32 %v4396_v22, %v3209_v24  ;;  %v4883_v35 = vmov 0.0   ;;  %v3191_v39 = vld [vmem:[#allocation2 + $0x30] sm:$0xf]  ;;  %s4690_s26 = smul.u32 28, %s5126_s21 }
  0x20   : > { %443 = vperm.xlu0 %4738, %v438_v1   ;;  %v4383_v5 = vld [vmem:[%s422_s15] sm:$0xff]  ;;  %v4395_v26 = vld [vmem:[#allocation2 + $0x44] sm:$0xf0]  ;;  %v3201_v29 = vld [vmem:[#allocation2 + $0x48] sm:$0xf0] }
  0x21   : > { %3164 = vmatmul.msk.bf16.vlgmr.msra.gmra.mxu1 %vm509_vm0, %v4383_v5  ;;  %633 = vmatpush.bf16.msra.mxu2 %v3216_v18  ;;  %v4394_v28 = vld [vmem:[#allocation2 + $0x44] sm:$0xf]  ;;  %v3200_v30 = vor.u32 %v4395_v26, %v3199_v25  ;;  %v4393_v40 = vld [vmem:[#allocation2 + $0x34] sm:$0xf0]  ;;  %v4392_v41 = vld [vmem:[#allocation2 + $0x34] sm:$0xf]  ;;  %s5091_s28 = scalar_lea.vmem %s5119_s10, %s4690_s26 }
  0x22   : > { %647 = vmatpush.bf16.msra.mxu3 %v3220_v19  ;;  %v3204_v31 = vor.u32 %v4394_v28, %v3201_v29  ;;  %v3192_v42 = vor.u32 %v4393_v40, %v3191_v39  ;;  %v3193_v43 = vld [vmem:[#allocation2 + $0x38] sm:$0xf0]  ;;  %v3183_v45 = vld [vmem:[#allocation2 + $0x20] sm:$0xf]  ;;  %v4391_v46 = vld [vmem:[#allocation2 + $0x24] sm:$0xf0] }
  0x23   : > { %v3196_v44 = vor.u32 %v4392_v41, %v3193_v43  ;;  %v4390_v47 = vld [vmem:[#allocation2 + $0x24] sm:$0xf]  ;;  %v3184_v48 = vor.u32 %v4391_v46, %v3183_v45  ;;  %v3185_v49 = vld [vmem:[#allocation2 + $0x28] sm:$0xf0]  ;;  %v3175_v51 = vld [vmem:[#allocation2 + $0x10] sm:$0xf] }
  0x24   : > { %v3188_v50 = vor.u32 %v4390_v47, %v3185_v49  ;;  %v4389_v52 = vld [vmem:[#allocation2 + $0x14] sm:$0xf0]  ;;  %v4388_v53 = vld [vmem:[#allocation2 + $0x14] sm:$0xf]  ;;  %v3177_v55 = vld [vmem:[#allocation2 + $0x18] sm:$0xf0] }
  0x25   : > { %634 = vmatpush.bf16.msra.mxu2 %v3208_v23  ;;  %v3176_v54 = vor.u32 %v4389_v52, %v3175_v51  ;;  %v3180_v56 = vor.u32 %v4388_v53, %v3177_v55  ;;  %v3167_v57 = vld [vmem:[#allocation2] sm:$0xf]  ;;  %v4387_v58 = vld [vmem:[#allocation2 + $0x4] sm:$0xf0]  ;;  %v4386_v59 = vld [vmem:[#allocation2 + $0x4] sm:$0xf] }
  0x26   : > { %648 = vmatpush.bf16.msra.mxu3 %v3212_v27  ;;  %v3168_v60 = vor.u32 %v4387_v58, %v3167_v57  ;;  %v3169_v61 = vld [vmem:[#allocation2 + $0x8] sm:$0xf0]  ;;  %v3343_v63 = vld [vmem:[#allocation4 + $0xe0] sm:$0xf]  ;;  %v4432_v0 = vld [vmem:[#allocation4 + $0xec] sm:$0xf0] }
  0x27   : > { %v3172_v62 = vor.u32 %v4386_v59, %v3169_v61  ;;  %v3471_v1 = vld [vmem:[#allocation4 + $0x1e0] sm:$0xf]  ;;  %v3344_v2 = vor.u32 %v4432_v0, %v3343_v63  ;;  %v4464_v3 = vld [vmem:[#allocation4 + $0x1ec] sm:$0xf0]  ;;  %v4430_v4 = vld [vmem:[#allocation4 + $0xe4] sm:$0xf] }
  0x28   : > { %446 = vperm.xlu0 %4738, %v439_v6   ;;  %v3345_v5 = vld [vmem:[#allocation4 + $0xf0] sm:$0xf0]  ;;  %v3472_v6 = vor.u32 %v4464_v3, %v3471_v1  ;;  %v4462_v8 = vld [vmem:[#allocation4 + $0x1e4] sm:$0xf]  ;;  %v3327_v10 = vld [vmem:[#allocation4 + $0xc0] sm:$0xf] }
  0x29   : > { %635 = vmatpush.bf16.msra.mxu2 %v3200_v30  ;;  %v3348_v7 = vor.u32 %v4430_v4, %v3345_v5  ;;  %v3473_v9 = vld [vmem:[#allocation4 + $0x1f0] sm:$0xf0]  ;;  %1060 = vmatpush.bf16.msrb.mxu0 %v3344_v2  ;;  %v4428_v12 = vld [vmem:[#allocation4 + $0xcc] sm:$0xf0]  ;;  %v3455_v13 = vld [vmem:[#allocation4 + $0x1c0] sm:$0xf] }
  0x2a   : > { %649 = vmatpush.bf16.msra.mxu3 %v3204_v31  ;;  %v3476_v11 = vor.u32 %v4462_v8, %v3473_v9  ;;  %v4460_v14 = vld [vmem:[#allocation4 + $0x1cc] sm:$0xf0]  ;;  %1074 = vmatpush.bf16.msrb.mxu1 %v3472_v6  ;;  %v3328_v15 = vor.u32 %v4428_v12, %v3327_v10  ;;  %v4426_v17 = vld [vmem:[#allocation4 + $0xc4] sm:$0xf]  ;;  %v3329_v18 = vld [vmem:[#allocation4 + $0xd0] sm:$0xf0] }
  0x2b   : > { %v3456_v16 = vor.u32 %v4460_v14, %v3455_v13  ;;  %v4458_v19 = vld [vmem:[#allocation4 + $0x1c4] sm:$0xf]  ;;  %v3332_v20 = vor.u32 %v4426_v17, %v3329_v18  ;;  %v3457_v21 = vld [vmem:[#allocation4 + $0x1d0] sm:$0xf0]  ;;  %v3311_v22 = vld [vmem:[#allocation4 + $0xa0] sm:$0xf] }
  0x2c   : > { %v4424_v23 = vld [vmem:[#allocation4 + $0xac] sm:$0xf0]  ;;  %v3460_v24 = vor.u32 %v4458_v19, %v3457_v21  ;;  %v3439_v25 = vld [vmem:[#allocation4 + $0x1a0] sm:$0xf]  ;;  %v4422_v27 = vld [vmem:[#allocation4 + $0xa4] sm:$0xf] }
  0x2d   : > { %636 = vmatpush.bf16.msra.mxu2 %v3192_v42  ;;  %v4456_v26 = vld [vmem:[#allocation4 + $0x1ac] sm:$0xf0]  ;;  %1061 = vmatpush.bf16.msrb.mxu0 %v3328_v15  ;;  %v3312_v28 = vor.u32 %v4424_v23, %v3311_v22  ;;  %v3313_v29 = vld [vmem:[#allocation4 + $0xb0] sm:$0xf0]  ;;  %v4454_v30 = vld [vmem:[#allocation4 + $0x1a4] sm:$0xf] }
  0x2e   : > { %650 = vmatpush.bf16.msra.mxu3 %v3196_v44  ;;  %v3441_v31 = vld [vmem:[#allocation4 + $0x1b0] sm:$0xf0]  ;;  %1075 = vmatpush.bf16.msrb.mxu1 %v3456_v16  ;;  %v3440_v32 = vor.u32 %v4456_v26, %v3439_v25  ;;  %v4418_v39 = vld [vmem:[#allocation4 + $0x84] sm:$0xf]  ;;  %v3279_v46 = vld [vmem:[#allocation4 + $0x60] sm:$0xf] }
  0x2f   : > { %v3297_v40 = vld [vmem:[#allocation4 + $0x90] sm:$0xf0]  ;;  %v4450_v41 = vld [vmem:[#allocation4 + $0x184] sm:$0xf]  ;;  %v4416_v47 = vld [vmem:[#allocation4 + $0x6c] sm:$0xf0] }
  0x30   : > { %v3425_v42 = vld [vmem:[#allocation4 + $0x190] sm:$0xf0]  ;;  %v3300_v45 = vor.u32 %v4418_v39, %v3297_v40  ;;  %v4414_v51 = vld [vmem:[#allocation4 + $0x64] sm:$0xf]  ;;  %v3263_v59 = vld [vmem:[#allocation4 + $0x40] sm:$0xf] }
  0x31   : > { %637 = vmatpush.bf16.msra.mxu2 %v3184_v48  ;;  %1062 = vmatpush.bf16.msrb.mxu0 %v3312_v28  ;;  %v3407_v48 = vld [vmem:[#allocation4 + $0x160] sm:$0xf]  ;;  %v3428_v49 = vor.u32 %v4450_v41, %v3425_v42  ;;  %v3281_v52 = vld [vmem:[#allocation4 + $0x70] sm:$0xf0]  ;;  %v4446_v53 = vld [vmem:[#allocation4 + $0x164] sm:$0xf] }
  0x32   : > { %651 = vmatpush.bf16.msra.mxu3 %v3188_v50  ;;  %1076 = vmatpush.bf16.msrb.mxu1 %v3440_v32  ;;  %v4448_v50 = vld [vmem:[#allocation4 + $0x16c] sm:$0xf0]  ;;  %v3284_v58 = vor.u32 %v4414_v51, %v3281_v52  ;;  %v3391_v61 = vld [vmem:[#allocation4 + $0x140] sm:$0xf]  ;;  %v4410_v1 = vld [vmem:[#allocation4 + $0x44] sm:$0xf] }
  0x33   : > { %v3408_v57 = vor.u32 %v4448_v50, %v3407_v48  ;;  %v4444_v0 = vld [vmem:[#allocation4 + $0x14c] sm:$0xf0]  ;;  %v3265_v2 = vld [vmem:[#allocation4 + $0x50] sm:$0xf0]  ;;  %v4442_v3 = vld [vmem:[#allocation4 + $0x144] sm:$0xf] }
  0x34   : > { %v3393_v4 = vld [vmem:[#allocation4 + $0x150] sm:$0xf0]  ;;  %v3392_v6 = vor.u32 %v4444_v0, %v3391_v61  ;;  %v3247_v8 = vld [vmem:[#allocation4 + $0x20] sm:$0xf]  ;;  %v4408_v9 = vld [vmem:[#allocation4 + $0x2c] sm:$0xf0] }
  0x35   : > { %638 = vmatpush.bf16.msra.mxu2 %v3176_v54  ;;  %v3409_v54 = vld [vmem:[#allocation4 + $0x170] sm:$0xf0]  ;;  %v3375_v10 = vld [vmem:[#allocation4 + $0x120] sm:$0xf]  ;;  %v4440_v12 = vld [vmem:[#allocation4 + $0x12c] sm:$0xf0]  ;;  %v3248_v17 = vor.u32 %v4408_v9, %v3247_v8 }
  0x36   : > { %652 = vmatpush.bf16.msra.mxu3 %v3180_v56  ;;  %v3280_v56 = vor.u32 %v4416_v47, %v3279_v46  ;;  %v3412_v63 = vor.u32 %v4446_v53, %v3409_v54  ;;  %v4406_v13 = vld [vmem:[#allocation4 + $0x24] sm:$0xf]  ;;  %v3249_v14 = vld [vmem:[#allocation4 + $0x30] sm:$0xf0]  ;;  %v3376_v19 = vor.u32 %v4440_v12, %v3375_v10  ;;  %v3231_v21 = vld [vmem:[#allocation4] sm:$0xf] }
  0x37   : > { %v4438_v15 = vld [vmem:[#allocation4 + $0x124] sm:$0xf]  ;;  %v3377_v16 = vld [vmem:[#allocation4 + $0x130] sm:$0xf0]  ;;  %v4404_v22 = vld [vmem:[#allocation4 + $0xc] sm:$0xf0] }
  0x38   : > { %v3380_v25 = vor.u32 %v4438_v15, %v3377_v16  ;;  %v3359_v26 = vld [vmem:[#allocation4 + $0x100] sm:$0xf]  ;;  %v4436_v28 = vld [vmem:[#allocation4 + $0x10c] sm:$0xf0]  ;;  %v4434_v32 = vld [vmem:[#allocation4 + $0x104] sm:$0xf] }
  0x39   : > { %639 = vmatpush.bf16.msra.mxu2 %v3168_v60  ;;  %v4412_v60 = vld [vmem:[#allocation4 + $0x4c] sm:$0xf0]  ;;  %v3351_v40 = vld [vmem:[#allocation4 + $0xe8] sm:$0xf]  ;;  %v4433_v41 = vld [vmem:[#allocation4 + $0xf4] sm:$0xf0] }
  0x3a   : > { %653 = vmatpush.bf16.msra.mxu3 %v3172_v62  ;;  %v3264_v5 = vor.u32 %v4412_v60, %v3263_v59  ;;  %v3479_v42 = vld [vmem:[#allocation4 + $0x1e8] sm:$0xf]  ;;  %v3353_v46 = vld [vmem:[#allocation4 + $0xf8] sm:$0xf0]  ;;  %v4429_v53 = vld [vmem:[#allocation4 + $0xd4] sm:$0xf0] }
  0x3b   : > { %v3481_v50 = vld [vmem:[#allocation4 + $0x1f8] sm:$0xf0]  ;;  %v3335_v52 = vld [vmem:[#allocation4 + $0xc8] sm:$0xf]  ;;  %v4459_v61 = vld [vmem:[#allocation4 + $0x1cc] sm:$0xf] }
  0x3c   : > { %v3463_v54 = vld [vmem:[#allocation4 + $0x1c8] sm:$0xf]  ;;  %v4455_v9 = vld [vmem:[#allocation4 + $0x1ac] sm:$0xf]  ;;  %v3449_v10 = vld [vmem:[#allocation4 + $0x1b8] sm:$0xf0] }
  0x3d   : > { %1088 = vmatpush.bf16.msrb.mxu2 %v3348_v7  ;;  %v3268_v7 = vor.u32 %v4410_v1, %v3265_v2  ;;  %v3319_v0 = vld [vmem:[#allocation4 + $0xa8] sm:$0xf]  ;;  %v4425_v1 = vld [vmem:[#allocation4 + $0xb4] sm:$0xf0] }
  0x3e   : > { %1102 = vmatpush.bf16.msrb.mxu3 %v3476_v11  ;;  %v3396_v11 = vor.u32 %v4442_v3, %v3393_v4  ;;  %v3447_v2 = vld [vmem:[#allocation4 + $0x1a8] sm:$0xf]  ;;  %v3320_v3 = vor.u32 %v4425_v1, %v3319_v0  ;;  %v4457_v4 = vld [vmem:[#allocation4 + $0x1b4] sm:$0xf0]  ;;  %v4403_v0 = vld [vmem:[#allocation4 + $0xc] sm:$0xf] }
  0x3f   : > { %v3303_v12 = vld [vmem:[#allocation4 + $0x88] sm:$0xf]  ;;  %v4453_v16 = vld [vmem:[#allocation4 + $0x194] sm:$0xf0]  ;;  %v3241_v1 = vld [vmem:[#allocation4 + $0x18] sm:$0xf0] }
  0x41   : > { %1089 = vmatpush.bf16.msrb.mxu2 %v3332_v20  ;;  %v3252_v20 = vor.u32 %v4406_v13, %v3249_v14  ;;  %v4421_v13 = vld [vmem:[#allocation4 + $0x94] sm:$0xf0]  ;;  %v3431_v14 = vld [vmem:[#allocation4 + $0x188] sm:$0xf] }
  0x42   : > { %1103 = vmatpush.bf16.msrb.mxu3 %v3460_v24  ;;  %v3304_v15 = vor.u32 %v4421_v13, %v3303_v12 }
  0x92   : > { %v444_v34 = vpop.permute.xlu0 %443 }
  0x93   : > { %vm448_vm2 = vcmp.eq.s32.totalorder %v444_v34, %v441_v33  ;;  %v3295_v34 = vld [vmem:[#allocation4 + $0x80] sm:$0xf] }
  0x94   : > { %v3148_v36 = vsel %vm448_vm2, 1.0, %v4883_v35 }
  0x95   : > { %3150 = vmatmul.msk.f32.vlgmr.msra.gmra.mxu0 %vm456_vm1, %v3148_v36  ;;  %v3423_v36 = vld [vmem:[#allocation4 + $0x180] sm:$0xf] }
  0x9a   : > { %v447_v37 = vpop.permute.xlu0 %446 }
  0x9b   : > { %vm449_vm3 = vcmp.eq.s32.totalorder %v447_v37, %v441_v33  ;;  %v3316_v33 = vor.u32 %v4422_v27, %v3313_v29  ;;  %v3444_v37 = vor.u32 %v4454_v30, %v3441_v31  ;;  %v4402_v29 = vld [vmem:[#allocation4 + $0x4] sm:$0xf]  ;;  %v3233_v30 = vld [vmem:[#allocation4 + $0x10] sm:$0xf0]  ;;  %v3232_v31 = vor.u32 %v4404_v22, %v3231_v21  ;;  %v4451_v21 = vld [vmem:[#allocation4 + $0x18c] sm:$0xf] }
  0x9c   : > { %v3149_v38 = vsel %vm449_vm3, 1.0, %v4883_v35  ;;  %v4420_v35 = vld [vmem:[#allocation4 + $0x8c] sm:$0xf0]  ;;  %v3433_v22 = vld [vmem:[#allocation4 + $0x198] sm:$0xf0] }
  0x9d   : > { %3151 = vmatmul.msk.f32.gmra.mxu0 %vm456_vm1, %v3149_v38  ;;  %v4452_v38 = vld [vmem:[#allocation4 + $0x18c] sm:$0xf0]  ;;  %v3296_v43 = vor.u32 %v4420_v35, %v3295_v34  ;;  %1090 = vmatpush.bf16.msrb.mxu2 %v3316_v33  ;;  %v3361_v33 = vld [vmem:[#allocation4 + $0x110] sm:$0xf0] }
  0x9e   : > { %v3424_v44 = vor.u32 %v4452_v38, %v3423_v36  ;;  %1104 = vmatpush.bf16.msrb.mxu3 %v3444_v37  ;;  %v522_v55 = vpop.f32.mrf.mxu1  ;;  %v3360_v36 = vor.u32 %v4436_v28, %v3359_v26  ;;  %v3236_v37 = vor.u32 %v4402_v29, %v3233_v30  ;;  %v3364_v39 = vor.u32 %v4434_v32, %v3361_v33  ;;  %v3415_v26 = vld [vmem:[#allocation4 + $0x168] sm:$0xf]  ;;  %v4449_v28 = vld [vmem:[#allocation4 + $0x174] sm:$0xf0]  ;;  %v4415_v29 = vld [vmem:[#allocation4 + $0x6c] sm:$0xf] }
  0x9f   : > { %1063 = vmatpush.bf16.msrb.mxu0 %v3296_v43  ;;  %v3352_v43 = vor.u32 %v4433_v41, %v3351_v40  ;;  %v3289_v30 = vld [vmem:[#allocation4 + $0x78] sm:$0xf0]  ;;  %v4447_v33 = vld [vmem:[#allocation4 + $0x16c] sm:$0xf] }
  0xa0   : > { %1077 = vmatpush.bf16.msrb.mxu1 %v3424_v44  ;;  %v4465_v44 = vld [vmem:[#allocation4 + $0x1f4] sm:$0xf0]  ;;  %v3292_v32 = vor.u32 %v4415_v29, %v3289_v30  ;;  %v4355_v29 = vld [vmem:[#allocation6 + $0x6c8] sm:$0xf]  ;;  %v4686_v30 = vld [vmem:[#allocation6 + $0x6e0] sm:$0xf0] }
  0xa1   : > { %1091 = vmatpush.bf16.msrb.mxu2 %v3300_v45  ;;  %v4431_v45 = vld [vmem:[#allocation4 + $0xec] sm:$0xf]  ;;  %v3480_v47 = vor.u32 %v4465_v44, %v3479_v42 }
  0xa2   : > { %1105 = vmatpush.bf16.msrb.mxu3 %v3428_v49  ;;  %v3356_v48 = vor.u32 %v4431_v45, %v3353_v46  ;;  %v4463_v49 = vld [vmem:[#allocation4 + $0x1ec] sm:$0xf]  ;;  %v3401_v46 = vld [vmem:[#allocation4 + $0x158] sm:$0xf0] }
  0xa3   : > { %1064 = vmatpush.bf16.msrb.mxu0 %v3280_v56  ;;  %v3484_v51 = vor.u32 %v4463_v49, %v3481_v50  ;;  %v4461_v56 = vld [vmem:[#allocation4 + $0x1d4] sm:$0xf0]  ;;  %v4411_v42 = vld [vmem:[#allocation4 + $0x4c] sm:$0xf]  ;;  %v3383_v50 = vld [vmem:[#allocation4 + $0x128] sm:$0xf] }
  0xa4   : > { %1078 = vmatpush.bf16.msrb.mxu1 %v3408_v57  ;;  %v4427_v57 = vld [vmem:[#allocation4 + $0xcc] sm:$0xf]  ;;  %v3464_v59 = vor.u32 %v4461_v56, %v3463_v54  ;;  %v3257_v54 = vld [vmem:[#allocation4 + $0x38] sm:$0xf0] }
  0xa5   : > { %1092 = vmatpush.bf16.msrb.mxu2 %v3284_v58  ;;  %v3337_v58 = vld [vmem:[#allocation4 + $0xd8] sm:$0xf0]  ;;  %v4443_v44 = vld [vmem:[#allocation4 + $0x14c] sm:$0xf] }
  0xa6   : > { %1106 = vmatpush.bf16.msrb.mxu3 %v3412_v63  ;;  %v524_v23 = vpop.f32.mrf.mxu1  ;;  %v3340_v60 = vor.u32 %v4427_v57, %v3337_v58  ;;  %v3404_v49 = vor.u32 %v4443_v44, %v3401_v46  ;;  %v3385_v56 = vld [vmem:[#allocation4 + $0x138] sm:$0xf0]  ;;  %v4679_v44 = vld [vmem:[#allocation6 + $0x6a8] sm:$0xf0]  ;;  %v3627_v46 = vld [vmem:[#allocation6 + $0x118] sm:$0xf] }
  0xa7   : > { %1065 = vmatpush.bf16.msrb.mxu0 %v3264_v5  ;;  %v4423_v5 = vld [vmem:[#allocation4 + $0xac] sm:$0xf] }
  0xa8   : > { %1079 = vmatpush.bf16.msrb.mxu1 %v3392_v6  ;;  %v3321_v6 = vld [vmem:[#allocation4 + $0xb8] sm:$0xf0] }
  0xa9   : > { %1093 = vmatpush.bf16.msrb.mxu2 %v3268_v7  ;;  %v3448_v7 = vor.u32 %v4457_v4, %v3447_v2  ;;  %v3324_v8 = vor.u32 %v4423_v5, %v3321_v6  ;;  %v4435_v2 = vld [vmem:[#allocation4 + $0x10c] sm:$0xf]  ;;  %v3244_v6 = vor.u32 %v4403_v0, %v3241_v1  ;;  %v4047_v0 = vld [vmem:[#allocation6 + $0x460] sm:$0xf] }
  0xaa   : > { %1107 = vmatpush.bf16.msrb.mxu3 %v3396_v11  ;;  %v3452_v11 = vor.u32 %v4455_v9, %v3449_v10 }
  0xab   : > { %1066 = vmatpush.bf16.msrb.mxu0 %v3248_v17  ;;  %v4419_v17 = vld [vmem:[#allocation4 + $0x8c] sm:$0xf] }
  0xac   : > { %1080 = vmatpush.bf16.msrb.mxu1 %v3376_v19  ;;  %v3432_v19 = vor.u32 %v4453_v16, %v3431_v14 }
  0xad   : > { %1094 = vmatpush.bf16.msrb.mxu2 %v3252_v20 }
  0xae   : > { %1108 = vmatpush.bf16.msrb.mxu3 %v3380_v25  ;;  %v4417_v25 = vld [vmem:[#allocation4 + $0x74] sm:$0xf0] }
  0xaf   : > { %1067 = vmatpush.bf16.msrb.mxu0 %v3232_v31  ;;  %v3416_v31 = vor.u32 %v4449_v28, %v3415_v26  ;;  %v4630_v26 = vld [vmem:[#allocation6 + $0x520] sm:$0xf0] }
  0xb0   : > { %1081 = vmatpush.bf16.msrb.mxu1 %v3360_v36 }
  0xb1   : > { %1095 = vmatpush.bf16.msrb.mxu2 %v3236_v37  ;;  %v4413_v37 = vld [vmem:[#allocation4 + $0x54] sm:$0xf0] }
  0xb2   : > { %1109 = vmatpush.bf16.msrb.mxu3 %v3364_v39  ;;  %v4445_v39 = vld [vmem:[#allocation4 + $0x154] sm:$0xf0] }
  0xb3   : > { %1116 = vmatpush.bf16.msra.mxu0 %v3352_v43  ;;  %v3273_v43 = vld [vmem:[#allocation4 + $0x58] sm:$0xf0] }
  0xb4   : > { %1130 = vmatpush.bf16.msra.mxu1 %v3480_v47  ;;  %v3276_v45 = vor.u32 %v4411_v42, %v3273_v43  ;;  %v3255_v47 = vld [vmem:[#allocation4 + $0x28] sm:$0xf]  ;;  %v4623_v42 = vld [vmem:[#allocation6 + $0x4e8] sm:$0xf0]  ;;  %v4327_v43 = vld [vmem:[#allocation6 + $0x690] sm:$0xf] }
  0xb8   : > { %1131 = vmatpush.bf16.msra.mxu1 %v3464_v59  ;;  %v3239_v59 = vld [vmem:[#allocation4 + $0x8] sm:$0xf] }
  0xbc   : > { %1132 = vmatpush.bf16.msra.mxu1 %v3448_v7 }
  0xc0   : > { %1133 = vmatpush.bf16.msra.mxu1 %v3432_v19 }
  0xc4   : > { %1134 = vmatpush.bf16.msra.mxu1 %v3416_v31 }
 0x112   : > { %v480_v62 = vpop.f32.mrf.mxu0 }
 0x113   : > { %v523_v18 = vadd.f32 %v522_v55, %v480_v62  ;;  %v3336_v55 = vor.u32 %v4429_v53, %v3335_v52  ;;  %v3465_v62 = vld [vmem:[#allocation4 + $0x1d8] sm:$0xf0]  ;;  %v4407_v52 = vld [vmem:[#allocation4 + $0x2c] sm:$0xf] }
 0x114   : > { %v3468_v63 = vor.u32 %v4459_v61, %v3465_v62  ;;  %v3260_v58 = vor.u32 %v4407_v52, %v3257_v54  ;;  %v3367_v61 = vld [vmem:[#allocation4 + $0x108] sm:$0xf]  ;;  %v4075_v52 = vld [vmem:[#allocation6 + $0x498] sm:$0xf]  ;;  %v4616_v54 = vld [vmem:[#allocation6 + $0x4b0] sm:$0xf0] }
 0x115   : > { %v527_v34 = vmax.f32 %v523_v18, 0.0  ;;  %1117 = vmatpush.bf16.msra.mxu0 %v3336_v55  ;;  %v3305_v18 = vld [vmem:[#allocation4 + $0x98] sm:$0xf0]  ;;  %v4439_v55 = vld [vmem:[#allocation4 + $0x12c] sm:$0xf] }
 0x116   : > { %v3308_v20 = vor.u32 %v4419_v17, %v3305_v18  ;;  %v3388_v62 = vor.u32 %v4439_v55, %v3385_v56  ;;  %v3683_v17 = vld [vmem:[#allocation6 + $0x188] sm:$0xf]  ;;  %v4299_v55 = vld [vmem:[#allocation6 + $0x658] sm:$0xf]  ;;  %v4672_v56 = vld [vmem:[#allocation6 + $0x670] sm:$0xf0] }
 0x117   : > { %v4300_v1 = vor.u32 %v4672_v56, %v4299_v55 }
 0x119   : > { %1118 = vmatpush.bf16.msra.mxu0 %v3320_v3  ;;  %v3369_v3 = vld [vmem:[#allocation4 + $0x118] sm:$0xf0] }
 0x11a   : > { %v483_v24 = vpop.f32.mrf.mxu0  ;;  %v3372_v7 = vor.u32 %v4435_v2, %v3369_v3  ;;  %v4609_v2 = vld [vmem:[#allocation6 + $0x478] sm:$0xf0]  ;;  %v4271_v3 = vld [vmem:[#allocation6 + $0x620] sm:$0xf] }
 0x11b   : > { %v525_v27 = vadd.f32 %v524_v23, %v483_v24  ;;  %v3436_v23 = vor.u32 %v4451_v21, %v3433_v22  ;;  %v3287_v24 = vld [vmem:[#allocation4 + $0x68] sm:$0xf]  ;;  %v4574_v22 = vld [vmem:[#allocation6 + $0x360] sm:$0xf0] }
 0x11c   : > { %v3907_v21 = vld [vmem:[#allocation6 + $0x348] sm:$0xf] }
 0x11d   : > { %v528_v35 = vmax.f32 %v525_v27, 0.0  ;;  %1119 = vmatpush.bf16.msra.mxu0 %v3304_v15  ;;  %v3288_v27 = vor.u32 %v4417_v25, %v3287_v24  ;;  %v4131_v25 = vld [vmem:[#allocation6 + $0x508] sm:$0xf] }
 0x11f   : > { %v529_v38 = vpack.c.bf16 %v528_v35, %v527_v34  ;;  %v3417_v34 = vld [vmem:[#allocation4 + $0x178] sm:$0xf0]  ;;  %v3271_v35 = vld [vmem:[#allocation4 + $0x48] sm:$0xf] }
 0x120   : > { %v3420_v36 = vor.u32 %v4447_v33, %v3417_v34  ;;  %v3272_v40 = vor.u32 %v4413_v37, %v3271_v35  ;;  %v3655_v34 = vld [vmem:[#allocation6 + $0x150] sm:$0xf]  ;;  %v4511_v35 = vld [vmem:[#allocation6 + $0x168] sm:$0xf0] }
 0x121   : > { %640 = vmatmul.bf16.vlgmr.msra.gmra.mxu2 %v529_v38  ;;  %654 = vmatmul.bf16.vlgmr.msra.gmra.mxu3 %v529_v38  ;;  %v3399_v38 = vld [vmem:[#allocation4 + $0x148] sm:$0xf]  ;;  %v3879_v37 = vld [vmem:[#allocation6 + $0x310] sm:$0xf] }
 0x122   : > { %1144 = vmatpush.bf16.msra.mxu2 %v3356_v48  ;;  %1158 = vmatpush.bf16.msra.mxu3 %v3484_v51  ;;  %v3400_v41 = vor.u32 %v4445_v39, %v3399_v38  ;;  %v4409_v48 = vld [vmem:[#allocation4 + $0x34] sm:$0xf0]  ;;  %v4567_v38 = vld [vmem:[#allocation6 + $0x328] sm:$0xf0]  ;;  %v4132_v39 = vor.u32 %v4630_v26, %v4131_v25  ;;  %v3991_v25 = vld [vmem:[#allocation6 + $0x3f0] sm:$0xf] }
 0x123   : > { %1120 = vmatpush.bf16.msra.mxu0 %v3288_v27  ;;  %v4441_v51 = vld [vmem:[#allocation4 + $0x134] sm:$0xf0]  ;;  %v3256_v53 = vor.u32 %v4409_v48, %v3255_v47  ;;  %v4504_v47 = vld [vmem:[#allocation6 + $0x130] sm:$0xf0]  ;;  %v3880_v48 = vor.u32 %v4567_v38, %v3879_v37  ;;  %v4595_v26 = vld [vmem:[#allocation6 + $0x408] sm:$0xf0] }
 0x124   : > { %1135 = vmatpush.bf16.msra.mxu1 %v3400_v41  ;;  %v3384_v57 = vor.u32 %v4441_v51, %v3383_v50  ;;  %v4356_v41 = vor.u32 %v4686_v30, %v4355_v29  ;;  %v4560_v50 = vld [vmem:[#allocation6 + $0x2f0] sm:$0xf0] }
 0x125   : > { %v4476_v30 = vld [vmem:[#allocation6 + $0x50] sm:$0xf0] }
 0x126   : > { %1145 = vmatpush.bf16.msra.mxu2 %v3340_v60  ;;  %1159 = vmatpush.bf16.msra.mxu3 %v3468_v63  ;;  %v4405_v60 = vld [vmem:[#allocation4 + $0x14] sm:$0xf0]  ;;  %v4588_v37 = vld [vmem:[#allocation6 + $0x3d0] sm:$0xf0] }
 0x127   : > { %1121 = vmatpush.bf16.msra.mxu0 %v3272_v40  ;;  %v4437_v63 = vld [vmem:[#allocation4 + $0x114] sm:$0xf0]  ;;  %v3240_v4 = vor.u32 %v4405_v60, %v3239_v59  ;;  %v4103_v40 = vld [vmem:[#allocation6 + $0x4d0] sm:$0xf]  ;;  %v4497_v59 = vld [vmem:[#allocation6 + $0xf8] sm:$0xf0] }
 0x128   : > { %1136 = vmatpush.bf16.msra.mxu1 %v3384_v57  ;;  %v3368_v5 = vor.u32 %v4437_v63, %v3367_v61  ;;  %v4104_v51 = vor.u32 %v4623_v42, %v4103_v40  ;;  %v3628_v57 = vor.u32 %v4504_v47, %v3627_v46  ;;  %v3823_v61 = vld [vmem:[#allocation6 + $0x2a0] sm:$0xf]  ;;  %v4076_v63 = vor.u32 %v4616_v54, %v4075_v52  ;;  %v4525_v42 = vld [vmem:[#allocation6 + $0x1d8] sm:$0xf0]  ;;  %v3909_v46 = vld [vmem:[#allocation6 + $0x364] sm:$0xf0] }
 0x129   : > { %v3657_v52 = vld [vmem:[#allocation6 + $0x16c] sm:$0xf0] }
 0x12a   : > { %1146 = vmatpush.bf16.msra.mxu2 %v3324_v8  ;;  %1160 = vmatpush.bf16.msra.mxu3 %v3452_v11  ;;  %v546_v8 = vld [vmem:[%s5114_s5] sm:$0x3]  ;;  %v3881_v54 = vld [vmem:[#allocation6 + $0x32c] sm:$0xf0] }
 0x12b   : > { %1122 = vmatpush.bf16.msra.mxu0 %v3256_v53  ;;  %v548_v11 = vperm.slane %v546_v8, 0  ;;  %v549_v12 = vperm.slane %v546_v8, 1  ;;  %v4328_v53 = vor.u32 %v4679_v44, %v4327_v43  ;;  %v3685_v44 = vld [vmem:[#allocation6 + $0x1a4] sm:$0xf0] }
 0x12c   : > { %1137 = vmatpush.bf16.msra.mxu1 %v3368_v5 }
 0x12e   : > { %1147 = vmatpush.bf16.msra.mxu2 %v3308_v20  ;;  %1161 = vmatpush.bf16.msra.mxu3 %v3436_v23  ;;  %v4518_v20 = vld [vmem:[#allocation6 + $0x1a0] sm:$0xf0] }
 0x12f   : > { %1123 = vmatpush.bf16.msra.mxu0 %v3240_v4  ;;  %v3684_v33 = vor.u32 %v4518_v20, %v3683_v17  ;;  %v4665_v4 = vld [vmem:[#allocation6 + $0x638] sm:$0xf0]  ;;  %v4483_v20 = vld [vmem:[#allocation6 + $0x88] sm:$0xf0] }
 0x132   : > { %1148 = vmatpush.bf16.msra.mxu2 %v3292_v32  ;;  %1162 = vmatpush.bf16.msra.mxu3 %v3420_v36  ;;  %v3908_v36 = vor.u32 %v4574_v22, %v3907_v21  ;;  %v3767_v21 = vld [vmem:[#allocation6 + $0x230] sm:$0xf]  ;;  %v4539_v22 = vld [vmem:[#allocation6 + $0x248] sm:$0xf0] }
 0x133   : > { %v3768_v29 = vor.u32 %v4539_v22, %v3767_v21  ;;  %v3545_v21 = vld [vmem:[#allocation6 + $0x8c] sm:$0xf0]  ;;  %v4620_v22 = vld [vmem:[#allocation6 + $0x4d4] sm:$0xf] }
 0x136   : > { %1149 = vmatpush.bf16.msra.mxu2 %v3276_v45  ;;  %1163 = vmatpush.bf16.msra.mxu3 %v3404_v49  ;;  %v3656_v45 = vor.u32 %v4511_v35, %v3655_v34  ;;  %v3851_v49 = vld [vmem:[#allocation6 + $0x2d8] sm:$0xf]  ;;  %v4532_v34 = vld [vmem:[#allocation6 + $0x210] sm:$0xf0]  ;;  %v3992_v35 = vor.u32 %v4595_v26, %v3991_v25  ;;  %v4159_v25 = vld [vmem:[#allocation6 + $0x540] sm:$0xf] }
 0x137   : > { %v3852_v60 = vor.u32 %v4560_v50, %v3851_v49  ;;  %v4508_v50 = vld [vmem:[#allocation6 + $0x154] sm:$0xf]  ;;  %v4637_v26 = vld [vmem:[#allocation6 + $0x558] sm:$0xf0] }
 0x138   : > { %v3660_v55 = vor.u32 %v4508_v50, %v3657_v52 }
 0x13a   : > { %1150 = vmatpush.bf16.msra.mxu2 %v3260_v58  ;;  %1164 = vmatpush.bf16.msra.mxu3 %v3388_v62  ;;  %v3599_v58 = vld [vmem:[#allocation6 + $0xe0] sm:$0xf]  ;;  %v4553_v62 = vld [vmem:[#allocation6 + $0x2b8] sm:$0xf0] }
 0x13b   : > { %v3600_v5 = vor.u32 %v4497_v59, %v3599_v58  ;;  %v3824_v8 = vor.u32 %v4553_v62, %v3823_v61  ;;  %v3629_v58 = vld [vmem:[#allocation6 + $0x134] sm:$0xf0]  ;;  %v3601_v61 = vld [vmem:[#allocation6 + $0xfc] sm:$0xf0] }
 0x13e   : > { %1151 = vmatpush.bf16.msra.mxu2 %v3244_v6  ;;  %1165 = vmatpush.bf16.msra.mxu3 %v3372_v7  ;;  %v3571_v6 = vld [vmem:[#allocation6 + $0xa8] sm:$0xf]  ;;  %v4490_v7 = vld [vmem:[#allocation6 + $0xc0] sm:$0xf0] }
 0x13f   : > { %v3572_v17 = vor.u32 %v4490_v7, %v3571_v6  ;;  %v4581_v6 = vld [vmem:[#allocation6 + $0x398] sm:$0xf0] }
 0x1a4   : > { %v641_v9 = vpop.f32.mrf.mxu2  ;;  %v655_v10 = vpop.f32.mrf.mxu3 }
 0x1a5   : > { %v642_v13 = vadd.f32 %v641_v9, %v548_v11  ;;  %v656_v14 = vadd.f32 %v655_v10, %v549_v12  ;;  %v3795_v9 = vld [vmem:[#allocation6 + $0x268] sm:$0xf]  ;;  %v4546_v10 = vld [vmem:[#allocation6 + $0x280] sm:$0xf0] }
 0x1a7   : > { %v660_v23 = vmax.f32 %v642_v13, 0.0  ;;  %v661_v24 = vmax.f32 %v656_v14, 0.0  ;;  %v4272_v13 = vor.u32 %v4665_v4, %v4271_v3  ;;  %v4602_v14 = vld [vmem:[#allocation6 + $0x440] sm:$0xf0]  ;;  %v3853_v3 = vld [vmem:[#allocation6 + $0x2f4] sm:$0xf0] }
 0x1ac   : > { %v643_v15 = vpop.f32.mrf.mxu2  ;;  %v657_v16 = vpop.f32.mrf.mxu3 }
 0x1ad   : > { %v644_v18 = vadd.f32 %v643_v15, %v548_v11  ;;  %v658_v19 = vadd.f32 %v657_v16, %v549_v12  ;;  %v4048_v11 = vor.u32 %v4609_v2, %v4047_v0  ;;  %v4019_v12 = vld [vmem:[#allocation6 + $0x428] sm:$0xf]  ;;  %v4658_v16 = vld [vmem:[#allocation6 + $0x600] sm:$0xf0]  ;;  %v4651_v0 = vld [vmem:[#allocation6 + $0x5c8] sm:$0xf0] }
 0x1ae   : > { %v4243_v15 = vld [vmem:[#allocation6 + $0x5e8] sm:$0xf]  ;;  %v4557_v2 = vld [vmem:[#allocation6 + $0x2dc] sm:$0xf] }
 0x1af   : > { %v662_v27 = vmax.f32 %v644_v18, 0.0  ;;  %v663_v28 = vmax.f32 %v658_v19, 0.0  ;;  %v3543_v18 = vld [vmem:[#allocation6 + $0x70] sm:$0xf]  ;;  %v3796_v19 = vor.u32 %v4546_v10, %v3795_v9  ;;  %v3856_v4 = vor.u32 %v4557_v2, %v3853_v3  ;;  %v3573_v9 = vld [vmem:[#allocation6 + $0xc4] sm:$0xf0] }
 0x1b0   : > { %v4627_v10 = vld [vmem:[#allocation6 + $0x50c] sm:$0xf]  ;;  %v4273_v2 = vld [vmem:[#allocation6 + $0x63c] sm:$0xf0] }
 0x1b1   : > { %v5017_v31 = vpack.c.bf16 %v662_v27, %v660_v23  ;;  %v5019_v32 = vpack.c.bf16 %v663_v28, %v661_v24  ;;  %v4020_v23 = vor.u32 %v4602_v14, %v4019_v12  ;;  %v4244_v24 = vor.u32 %v4658_v16, %v4243_v15  ;;  %v3515_v28 = vld [vmem:[#allocation6 + $0x38] sm:$0xf]  ;;  %v4133_v12 = vld [vmem:[#allocation6 + $0x524] sm:$0xf0]  ;;  %v4644_v14 = vld [vmem:[#allocation6 + $0x590] sm:$0xf0] }
 0x1b2   : > { %v3544_v27 = vor.u32 %v4483_v20, %v3543_v18  ;;  %v3516_v38 = vor.u32 %v4476_v30, %v3515_v28  ;;  %v4136_v15 = vor.u32 %v4627_v10, %v4133_v12  ;;  %v3825_v18 = vld [vmem:[#allocation6 + $0x2bc] sm:$0xf0]  ;;  %v4480_v20 = vld [vmem:[#allocation6 + $0x74] sm:$0xf]  ;;  %v4160_v28 = vor.u32 %v4637_v26, %v4159_v25  ;;  %v3797_v30 = vld [vmem:[#allocation6 + $0x284] sm:$0xf0] }
 0x1b3   : > { %1068 = vmatmul.bf16.vlgmr.msrb.gmra.mxu0 %v5017_v31  ;;  %1082 = vmatmul.bf16.vlgmr.msrb.gmra.mxu1 %v5019_v32  ;;  %v4585_v10 = vld [vmem:[#allocation6 + $0x3bc] sm:$0xf] }
 0x1b4   : > { %1096 = vmatmul.bf16.vlgmr.msrb.gmra.mxu2 %v5017_v31  ;;  %1110 = vmatmul.bf16.vlgmr.msrb.gmra.mxu3 %v5019_v32 }
 0x1b5   : > { %2608 = vmatpush.bf16.msrb.mxu0 %v3684_v33  ;;  %2622 = vmatpush.bf16.msrb.mxu1 %v3908_v36  ;;  %v3739_v33 = vld [vmem:[#allocation6 + $0x1f8] sm:$0xf] }
 0x1b6   : > { %2636 = vmatpush.bf16.msrb.mxu2 %v4132_v39  ;;  %2650 = vmatpush.bf16.msrb.mxu3 %v4356_v41  ;;  %v3963_v36 = vld [vmem:[#allocation6 + $0x3b8] sm:$0xf]  ;;  %v3487_v39 = vld [vmem:[#allocation6] sm:$0xf]  ;;  %v3740_v40 = vor.u32 %v4532_v34, %v3739_v33  ;;  %v4683_v33 = vld [vmem:[#allocation6 + $0x6cc] sm:$0xf] }
 0x1b7   : > { %v3711_v41 = vld [vmem:[#allocation6 + $0x1c0] sm:$0xf]  ;;  %v3964_v43 = vor.u32 %v4588_v37, %v3963_v36  ;;  %v4473_v37 = vld [vmem:[#allocation6 + $0x3c] sm:$0xf] }
 0x1b9   : > { %2609 = vmatpush.bf16.msrb.mxu0 %v3656_v45  ;;  %2623 = vmatpush.bf16.msrb.mxu1 %v3880_v48  ;;  %v4571_v45 = vld [vmem:[#allocation6 + $0x34c] sm:$0xf]  ;;  %v3712_v48 = vor.u32 %v4525_v42, %v3711_v41  ;;  %v4536_v41 = vld [vmem:[#allocation6 + $0x234] sm:$0xf]  ;;  %v3769_v42 = vld [vmem:[#allocation6 + $0x24c] sm:$0xf0] }
 0x1ba   : > { %2637 = vmatpush.bf16.msrb.mxu2 %v4104_v51  ;;  %2651 = vmatpush.bf16.msrb.mxu3 %v4328_v53  ;;  %v3912_v51 = vor.u32 %v4571_v45, %v3909_v46  ;;  %v4564_v53 = vld [vmem:[#allocation6 + $0x314] sm:$0xf]  ;;  %v4329_v45 = vld [vmem:[#allocation6 + $0x6ac] sm:$0xf0] }
 0x1bb   : > { %v3884_v56 = vor.u32 %v4564_v53, %v3881_v54  ;;  %v4529_v53 = vld [vmem:[#allocation6 + $0x1fc] sm:$0xf]  ;;  %v3741_v54 = vld [vmem:[#allocation6 + $0x214] sm:$0xf0] }
 0x1bd   : > { %2610 = vmatpush.bf16.msrb.mxu0 %v3628_v57  ;;  %2624 = vmatpush.bf16.msrb.mxu1 %v3852_v60  ;;  %v4501_v57 = vld [vmem:[#allocation6 + $0x11c] sm:$0xf]  ;;  %v4494_v60 = vld [vmem:[#allocation6 + $0xe4] sm:$0xf] }
 0x1be   : > { %2638 = vmatpush.bf16.msrb.mxu2 %v4076_v63  ;;  %2652 = vmatpush.bf16.msrb.mxu3 %v4300_v1  ;;  %v3632_v59 = vor.u32 %v4501_v57, %v3629_v58  ;;  %v3604_v62 = vor.u32 %v4494_v60, %v3601_v61  ;;  %v4215_v63 = vld [vmem:[#allocation6 + $0x5b0] sm:$0xf]  ;;  %v4301_v57 = vld [vmem:[#allocation6 + $0x674] sm:$0xf0]  ;;  %v4021_v60 = vld [vmem:[#allocation6 + $0x444] sm:$0xf0] }
 0x1bf   : > { %v4216_v1 = vor.u32 %v4651_v0, %v4215_v63  ;;  %v3713_v63 = vld [vmem:[#allocation6 + $0x1dc] sm:$0xf0]  ;;  %v4662_v0 = vld [vmem:[#allocation6 + $0x624] sm:$0xf] }
 0x1c0   : > { %v4276_v3 = vor.u32 %v4662_v0, %v4273_v2  ;;  %v3887_v2 = vld [vmem:[#allocation6 + $0x318] sm:$0xf] }
 0x1c1   : > { %2611 = vmatpush.bf16.msrb.mxu0 %v3600_v5  ;;  %2625 = vmatpush.bf16.msrb.mxu1 %v3824_v8  ;;  %v3935_v5 = vld [vmem:[#allocation6 + $0x380] sm:$0xf]  ;;  %v4487_v8 = vld [vmem:[#allocation6 + $0xac] sm:$0xf] }
 0x1c2   : > { %2639 = vmatpush.bf16.msrb.mxu2 %v4048_v11  ;;  %2653 = vmatpush.bf16.msrb.mxu3 %v4272_v13  ;;  %v3936_v7 = vor.u32 %v4581_v6, %v3935_v5  ;;  %v3576_v11 = vor.u32 %v4487_v8, %v3573_v9  ;;  %v4187_v13 = vld [vmem:[#allocation6 + $0x578] sm:$0xf]  ;;  %v3993_v5 = vld [vmem:[#allocation6 + $0x40c] sm:$0xf0]  ;;  %v4245_v8 = vld [vmem:[#allocation6 + $0x604] sm:$0xf0] }
 0x1c3   : > { %1124 = vmatmul.bf16.vlgmr.msra.gmra.mxu0 %v5017_v31  ;;  %1138 = vmatmul.bf16.vlgmr.msra.gmra.mxu1 %v5019_v32  ;;  %v4188_v16 = vor.u32 %v4644_v14, %v4187_v13  ;;  %v4648_v13 = vld [vmem:[#allocation6 + $0x5b4] sm:$0xf]  ;;  %v4217_v14 = vld [vmem:[#allocation6 + $0x5cc] sm:$0xf0] }
 0x1c4   : > { %1152 = vmatmul.bf16.vlgmr.msra.gmra.mxu2 %v5017_v31  ;;  %1166 = vmatmul.bf16.vlgmr.msra.gmra.mxu3 %v5019_v32  ;;  %v4469_v31 = vld [vmem:[#allocation6 + $0x18] sm:$0xf0]  ;;  %v4515_v32 = vld [vmem:[#allocation6 + $0x18c] sm:$0xf] }
 0x1c5   : > { %2612 = vmatpush.bf16.msrb.mxu0 %v3572_v17  ;;  %2626 = vmatpush.bf16.msrb.mxu1 %v3796_v19  ;;  %v3488_v47 = vor.u32 %v4469_v31, %v3487_v39  ;;  %v3688_v49 = vor.u32 %v4515_v32, %v3685_v44  ;;  %v4550_v17 = vld [vmem:[#allocation6 + $0x2a4] sm:$0xf]  ;;  %v4613_v39 = vld [vmem:[#allocation6 + $0x49c] sm:$0xf]  ;;  %v3772_v44 = vor.u32 %v4536_v41, %v3769_v42 }
 0x1c6   : > { %2640 = vmatpush.bf16.msrb.mxu2 %v4020_v23  ;;  %2654 = vmatpush.bf16.msrb.mxu3 %v4244_v24  ;;  %v3828_v19 = vor.u32 %v4550_v17, %v3825_v18  ;;  %v3548_v23 = vor.u32 %v4480_v20, %v3545_v21  ;;  %v4105_v24 = vld [vmem:[#allocation6 + $0x4ec] sm:$0xf0]  ;;  %v4578_v17 = vld [vmem:[#allocation6 + $0x384] sm:$0xf]  ;;  %v3937_v18 = vld [vmem:[#allocation6 + $0x39c] sm:$0xf0] }
 0x1c7   : > { %v3940_v21 = vor.u32 %v4578_v17, %v3937_v18  ;;  %v4561_v17 = vld [vmem:[#allocation6 + $0x2f8] sm:$0xf0] }
 0x1c9   : > { %2613 = vmatpush.bf16.msrb.mxu0 %v3544_v27  ;;  %2627 = vmatpush.bf16.msrb.mxu1 %v3768_v29  ;;  %v4108_v27 = vor.u32 %v4620_v22, %v4105_v24  ;;  %v4543_v29 = vld [vmem:[#allocation6 + $0x26c] sm:$0xf]  ;;  %v4189_v24 = vld [vmem:[#allocation6 + $0x594] sm:$0xf0] }
 0x1ca   : > { %2641 = vmatpush.bf16.msrb.mxu2 %v3992_v35  ;;  %2655 = vmatpush.bf16.msrb.mxu3 %v4216_v1  ;;  %v3800_v34 = vor.u32 %v4543_v29, %v3797_v30  ;;  %v4357_v35 = vld [vmem:[#allocation6 + $0x6e4] sm:$0xf0] }
 0x1cb   : > { %v4360_v36 = vor.u32 %v4683_v33, %v4357_v35 }
 0x1cd   : > { %2614 = vmatpush.bf16.msrb.mxu0 %v3516_v38  ;;  %2628 = vmatpush.bf16.msrb.mxu1 %v3740_v40  ;;  %v3517_v38 = vld [vmem:[#allocation6 + $0x54] sm:$0xf0] }
 0x1ce   : > { %2642 = vmatpush.bf16.msrb.mxu2 %v3964_v43  ;;  %2656 = vmatpush.bf16.msrb.mxu3 %v4188_v16  ;;  %v3520_v31 = vor.u32 %v4473_v37, %v3517_v38  ;;  %v4077_v40 = vld [vmem:[#allocation6 + $0x4b4] sm:$0xf0]  ;;  %v4676_v43 = vld [vmem:[#allocation6 + $0x694] sm:$0xf]  ;;  %v4220_v16 = vor.u32 %v4648_v13, %v4217_v14 }
 0x1cf   : > { %v4080_v32 = vor.u32 %v4613_v39, %v4077_v40  ;;  %v4332_v46 = vor.u32 %v4676_v43, %v4329_v45  ;;  %v4519_v40 = vld [vmem:[#allocation6 + $0x1a8] sm:$0xf0] }
 0x1d1   : > { %2615 = vmatpush.bf16.msrb.mxu0 %v3488_v47  ;;  %2629 = vmatpush.bf16.msrb.mxu1 %v3712_v48  ;;  %v4466_v47 = vld [vmem:[#allocation6 + $0x4] sm:$0xf]  ;;  %v3489_v48 = vld [vmem:[#allocation6 + $0x1c] sm:$0xf0] }
 0x1d2   : > { %2643 = vmatpush.bf16.msrb.mxu2 %v3936_v7  ;;  %2657 = vmatpush.bf16.msrb.mxu3 %v4160_v28  ;;  %v3492_v50 = vor.u32 %v4466_v47, %v3489_v48  ;;  %v4655_v7 = vld [vmem:[#allocation6 + $0x5ec] sm:$0xf]  ;;  %v4161_v28 = vld [vmem:[#allocation6 + $0x55c] sm:$0xf0]  ;;  %v3663_v47 = vld [vmem:[#allocation6 + $0x158] sm:$0xf] }
 0x1d3   : > { %v4248_v9 = vor.u32 %v4655_v7, %v4245_v8  ;;  %v4512_v48 = vld [vmem:[#allocation6 + $0x170] sm:$0xf0]  ;;  %v4498_v7 = vld [vmem:[#allocation6 + $0x100] sm:$0xf0] }
 0x1d5   : > { %2664 = vmatpush.bf16.msra.mxu0 %v3688_v49  ;;  %2678 = vmatpush.bf16.msra.mxu1 %v3912_v51  ;;  %v4606_v49 = vld [vmem:[#allocation6 + $0x464] sm:$0xf]  ;;  %v4049_v51 = vld [vmem:[#allocation6 + $0x47c] sm:$0xf0] }
 0x1d6   : > { %2692 = vmatpush.bf16.msra.mxu2 %v4136_v15  ;;  %2706 = vmatpush.bf16.msra.mxu3 %v4360_v36  ;;  %v4052_v52 = vor.u32 %v4606_v49, %v4049_v51  ;;  %v5032_v15 = vld [vmem:[%s5116_s7] sm:$0xf] }
 0x1d7   : > { %v732_v22 = vperm.slane %v5032_v15, 0  ;;  %v735_v8 = vperm.slane %v5032_v15, 3 }
 0x1d9   : > { %2665 = vmatpush.bf16.msra.mxu0 %v3660_v55  ;;  %2679 = vmatpush.bf16.msra.mxu1 %v3884_v56  ;;  %v3744_v55 = vor.u32 %v4529_v53, %v3741_v54  ;;  %v4669_v56 = vld [vmem:[#allocation6 + $0x65c] sm:$0xf]  ;;  %v734_v53 = vperm.slane %v5032_v15, 2 }
 0x1da   : > { %2693 = vmatpush.bf16.msra.mxu2 %v4108_v27  ;;  %2707 = vmatpush.bf16.msra.mxu3 %v4332_v46  ;;  %v4304_v58 = vor.u32 %v4669_v56, %v4301_v57  ;;  %v4634_v27 = vld [vmem:[#allocation6 + $0x544] sm:$0xf]  ;;  %v3915_v56 = vld [vmem:[#allocation6 + $0x350] sm:$0xf]  ;;  %v4575_v57 = vld [vmem:[#allocation6 + $0x368] sm:$0xf0] }
 0x1db   : > { %v4164_v33 = vor.u32 %v4634_v27, %v4161_v28  ;;  %v3831_v27 = vld [vmem:[#allocation6 + $0x2a8] sm:$0xf]  ;;  %v4554_v28 = vld [vmem:[#allocation6 + $0x2c0] sm:$0xf0] }
 0x1dd   : > { %2666 = vmatpush.bf16.msra.mxu0 %v3632_v59  ;;  %2680 = vmatpush.bf16.msra.mxu1 %v3856_v4  ;;  %v4599_v59 = vld [vmem:[#allocation6 + $0x42c] sm:$0xf]  ;;  %v4592_v4 = vld [vmem:[#allocation6 + $0x3f4] sm:$0xf] }
 0x1de   : > { %2694 = vmatpush.bf16.msra.mxu2 %v4080_v32  ;;  %v4024_v61 = vor.u32 %v4599_v59, %v4021_v60  ;;  %2708 = vmatpush.bf16.msra.mxu3 %v4304_v58  ;;  %v3996_v6 = vor.u32 %v4592_v4, %v3993_v5  ;;  %v3635_v58 = vld [vmem:[#allocation6 + $0x120] sm:$0xf]  ;;  %v4505_v59 = vld [vmem:[#allocation6 + $0x138] sm:$0xf0] }
 0x1e1   : > { %2667 = vmatpush.bf16.msra.mxu0 %v3604_v62  ;;  %2681 = vmatpush.bf16.msra.mxu1 %v3828_v19  ;;  %v4522_v62 = vld [vmem:[#allocation6 + $0x1c4] sm:$0xf] }
 0x1e2   : > { %2695 = vmatpush.bf16.msra.mxu2 %v4052_v52  ;;  %v3716_v1 = vor.u32 %v4522_v62, %v3713_v63  ;;  %2709 = vmatpush.bf16.msra.mxu3 %v4276_v3  ;;  %v3916_v63 = vor.u32 %v4575_v57, %v3915_v56  ;;  %v4568_v3 = vld [vmem:[#allocation6 + $0x330] sm:$0xf0]  ;;  %v3775_v56 = vld [vmem:[#allocation6 + $0x238] sm:$0xf] }
 0x1e5   : > { %2668 = vmatpush.bf16.msra.mxu0 %v3576_v11  ;;  %2682 = vmatpush.bf16.msra.mxu1 %v3800_v34  ;;  %v3965_v11 = vld [vmem:[#allocation6 + $0x3d4] sm:$0xf0]  ;;  %v733_v34 = vperm.slane %v5032_v15, 1 }
 0x1e6   : > { %2696 = vmatpush.bf16.msra.mxu2 %v4024_v61  ;;  %2710 = vmatpush.bf16.msra.mxu3 %v4248_v9  ;;  %v3968_v12 = vor.u32 %v4585_v10, %v3965_v11 }
 0x1e9   : > { %2669 = vmatpush.bf16.msra.mxu0 %v3548_v23  ;;  %2683 = vmatpush.bf16.msra.mxu1 %v3772_v44  ;;  %v4641_v23 = vld [vmem:[#allocation6 + $0x57c] sm:$0xf] }
 0x1ea   : > { %2697 = vmatpush.bf16.msra.mxu2 %v3996_v6  ;;  %2711 = vmatpush.bf16.msra.mxu3 %v4220_v16  ;;  %v4192_v25 = vor.u32 %v4641_v23, %v4189_v24  ;;  %v3607_v6 = vld [vmem:[#allocation6 + $0xe8] sm:$0xf]  ;;  %v3859_v16 = vld [vmem:[#allocation6 + $0x2e0] sm:$0xf]  ;;  %v4491_v23 = vld [vmem:[#allocation6 + $0xc8] sm:$0xf0] }
 0x1eb   : > { %v3608_v14 = vor.u32 %v4498_v7, %v3607_v6  ;;  %v4516_v6 = vld [vmem:[#allocation6 + $0x194] sm:$0xf]  ;;  %v3693_v7 = vld [vmem:[#allocation6 + $0x1ac] sm:$0xf0] }
 0x1ed   : > { %2670 = vmatpush.bf16.msra.mxu0 %v3520_v31  ;;  %2684 = vmatpush.bf16.msra.mxu1 %v3744_v55  ;;  %v3691_v31 = vld [vmem:[#allocation6 + $0x190] sm:$0xf]  ;;  %v3664_v55 = vor.u32 %v4512_v48, %v3663_v47  ;;  %v4083_v48 = vld [vmem:[#allocation6 + $0x4a0] sm:$0xf] }
 0x1ee   : > { %2698 = vmatpush.bf16.msra.mxu2 %v3968_v12  ;;  %2712 = vmatpush.bf16.msra.mxu3 %v4192_v25  ;;  %v3692_v43 = vor.u32 %v4519_v40, %v3691_v31  ;;  %v3888_v12 = vor.u32 %v4568_v3, %v3887_v2  ;;  %v3860_v25 = vor.u32 %v4561_v17, %v3859_v16  ;;  %v3495_v2 = vld [vmem:[#allocation6 + $0x8] sm:$0xf]  ;;  %v4470_v3 = vld [vmem:[#allocation6 + $0x20] sm:$0xf0]  ;;  %v4027_v16 = vld [vmem:[#allocation6 + $0x430] sm:$0xf] }
 0x1ef   : > { %v3832_v40 = vor.u32 %v4554_v28, %v3831_v27  ;;  %v4603_v17 = vld [vmem:[#allocation6 + $0x448] sm:$0xf0]  ;;  %v3917_v27 = vld [vmem:[#allocation6 + $0x36c] sm:$0xf0] }
 0x1f1   : > { %2671 = vmatpush.bf16.msra.mxu0 %v3492_v50  ;;  %2685 = vmatpush.bf16.msra.mxu1 %v3716_v1  ;;  %v3636_v1 = vor.u32 %v4505_v59, %v3635_v58  ;;  %v4540_v59 = vld [vmem:[#allocation6 + $0x250] sm:$0xf0] }
 0x1f2   : > { %2699 = vmatpush.bf16.msra.mxu2 %v3940_v21  ;;  %2713 = vmatpush.bf16.msra.mxu3 %v4164_v33 }
 0x230   : > { %v1069_v19 = vpop.f32.mrf.mxu0  ;;  %v1083_v20 = vpop.f32.mrf.mxu1 }
 0x231   : > { %v1070_v26 = vadd.f32 %v1069_v19, %v732_v22  ;;  %v4139_v19 = vld [vmem:[#allocation6 + $0x510] sm:$0xf] }
 0x233   : > { %v1084_v37 = vadd.f32 %v1083_v20, %v1070_v26  ;;  %v4631_v20 = vld [vmem:[#allocation6 + $0x528] sm:$0xf0] }
 0x234   : > { %v4140_v26 = vor.u32 %v4631_v20, %v4139_v19  ;;  %v4509_v20 = vld [vmem:[#allocation6 + $0x15c] sm:$0xf] }
 0x235   : > { %v1172_v41 = vmax.f32 %v1084_v37, 0.0 }
 0x237   : > { %v1097_v29 = vpop.f32.mrf.mxu2  ;;  %v1111_v30 = vpop.f32.mrf.mxu3 }
 0x238   : > { %v1071_v35 = vpop.f32.mrf.mxu0  ;;  %v1085_v36 = vpop.f32.mrf.mxu1  ;;  %v1098_v32 = vadd.f32 %v1097_v29, %v733_v34 }
 0x239   : > { %v1072_v38 = vadd.f32 %v1071_v35, %v732_v22  ;;  %v3579_v22 = vld [vmem:[#allocation6 + $0xb0] sm:$0xf]  ;;  %v4624_v35 = vld [vmem:[#allocation6 + $0x4f0] sm:$0xf0] }
 0x23a   : > { %v1112_v49 = vadd.f32 %v1111_v30, %v1098_v32  ;;  %v3580_v33 = vor.u32 %v4491_v23, %v3579_v22  ;;  %v3803_v32 = vld [vmem:[#allocation6 + $0x270] sm:$0xf]  ;;  %v3719_v22 = vld [vmem:[#allocation6 + $0x1c8] sm:$0xf]  ;;  %v4526_v23 = vld [vmem:[#allocation6 + $0x1e0] sm:$0xf0] }
 0x23b   : > { %v1086_v39 = vadd.f32 %v1085_v36, %v1072_v38  ;;  %v3551_v38 = vld [vmem:[#allocation6 + $0x78] sm:$0xf] }
 0x23c   : > { %v1173_v60 = vmax.f32 %v1112_v49, 0.0  ;;  %v4617_v49 = vld [vmem:[#allocation6 + $0x4b8] sm:$0xf0] }
 0x23d   : > { %v1176_v42 = vmax.f32 %v1086_v39, 0.0  ;;  %v4484_v39 = vld [vmem:[#allocation6 + $0x90] sm:$0xf0]  ;;  %v4084_v58 = vor.u32 %v4617_v49, %v4083_v48  ;;  %v3609_v48 = vld [vmem:[#allocation6 + $0x104] sm:$0xf0] }
 0x23e   : > { %v3552_v47 = vor.u32 %v4484_v39, %v3551_v38  ;;  %v4251_v39 = vld [vmem:[#allocation6 + $0x5f0] sm:$0xf] }
 0x23f   : > { %v5036_v44 = vpack.c.bf16 %v1176_v42, %v1172_v41  ;;  %v1099_v45 = vpop.f32.mrf.mxu2  ;;  %v1113_v46 = vpop.f32.mrf.mxu3 }
 0x240   : > { %v1100_v50 = vadd.f32 %v1099_v45, %v733_v34  ;;  %v1125_v51 = vpop.f32.mrf.mxu0  ;;  %v1139_v52 = vpop.f32.mrf.mxu1  ;;  %v4111_v34 = vld [vmem:[#allocation6 + $0x4d8] sm:$0xf]  ;;  %v4363_v45 = vld [vmem:[#allocation6 + $0x6d0] sm:$0xf] }
 0x241   : > { %2616 = vmatmul.bf16.vlgmr.msrb.gmra.mxu0 %v5036_v44  ;;  %v1126_v62 = vadd.f32 %v1125_v51, %v734_v53  ;;  %v4112_v42 = vor.u32 %v4624_v35, %v4111_v34  ;;  %v3720_v34 = vor.u32 %v4526_v23, %v3719_v22 }
 0x242   : > { %v1114_v54 = vadd.f32 %v1113_v46, %v1100_v50  ;;  %2720 = vmatpush.bf16.msrb.mxu0 %v3692_v43  ;;  %v4547_v43 = vld [vmem:[#allocation6 + $0x288] sm:$0xf0] }
 0x243   : > { %v1140_v10 = vadd.f32 %v1139_v52, %v1126_v62  ;;  %v4687_v46 = vld [vmem:[#allocation6 + $0x6e8] sm:$0xf0]  ;;  %v3523_v52 = vld [vmem:[#allocation6 + $0x40] sm:$0xf] }
 0x244   : > { %v1177_v61 = vmax.f32 %v1114_v54, 0.0  ;;  %v3804_v54 = vor.u32 %v4547_v43, %v3803_v32  ;;  %v4565_v32 = vld [vmem:[#allocation6 + $0x31c] sm:$0xf]  ;;  %v3971_v43 = vld [vmem:[#allocation6 + $0x3c0] sm:$0xf] }
 0x245   : > { %v1174_v24 = vmax.f32 %v1140_v10, 0.0  ;;  %v4533_v10 = vld [vmem:[#allocation6 + $0x218] sm:$0xf0] }
 0x246   : > { %v5040_v0 = vpack.c.bf16 %v1177_v61, %v1173_v60  ;;  %2721 = vmatpush.bf16.msrb.mxu0 %v3664_v55  ;;  %v4364_v55 = vor.u32 %v4687_v46, %v4363_v45  ;;  %v4335_v60 = vld [vmem:[#allocation6 + $0x698] sm:$0xf]  ;;  %v4680_v61 = vld [vmem:[#allocation6 + $0x6b0] sm:$0xf0]  ;;  %v4589_v45 = vld [vmem:[#allocation6 + $0x3d8] sm:$0xf0] }
 0x247   : > { %v1153_v4 = vpop.f32.mrf.mxu2  ;;  %v1167_v5 = vpop.f32.mrf.mxu3 }
 0x248   : > { %2630 = vmatmul.bf16.vlgmr.msrb.gmra.mxu1 %v5040_v0  ;;  %v1127_v9 = vpop.f32.mrf.mxu0  ;;  %v1141_v13 = vpop.f32.mrf.mxu1  ;;  %v1154_v21 = vadd.f32 %v1153_v4, %v735_v8  ;;  %v3776_v4 = vor.u32 %v4540_v59, %v3775_v56  ;;  %v3943_v56 = vld [vmem:[#allocation6 + $0x388] sm:$0xf]  ;;  %v4488_v59 = vld [vmem:[#allocation6 + $0xb4] sm:$0xf] }
 0x249   : > { %2734 = vmatpush.bf16.msrb.mxu1 %v3916_v63  ;;  %v1128_v11 = vadd.f32 %v1127_v9, %v734_v53  ;;  %v4477_v53 = vld [vmem:[#allocation6 + $0x58] sm:$0xf0]  ;;  %v4055_v63 = vld [vmem:[#allocation6 + $0x468] sm:$0xf] }
 0x24a   : > { %2722 = vmatpush.bf16.msrb.mxu0 %v3636_v1  ;;  %v1168_v36 = vadd.f32 %v1167_v5, %v1154_v21  ;;  %v3524_v62 = vor.u32 %v4477_v53, %v3523_v52  ;;  %v4610_v1 = vld [vmem:[#allocation6 + $0x480] sm:$0xf0]  ;;  %v4336_v5 = vor.u32 %v4680_v61, %v4335_v60  ;;  %v3665_v21 = vld [vmem:[#allocation6 + $0x174] sm:$0xf0]  ;;  %v3972_v52 = vor.u32 %v4589_v45, %v3971_v43  ;;  %v3581_v61 = vld [vmem:[#allocation6 + $0xcc] sm:$0xf0] }
 0x24b   : > { %v1142_v18 = vadd.f32 %v1141_v13, %v1128_v11  ;;  %v4056_v9 = vor.u32 %v4610_v1, %v4055_v63  ;;  %v4307_v11 = vld [vmem:[#allocation6 + $0x660] sm:$0xf]  ;;  %v3496_v13 = vor.u32 %v4470_v3, %v3495_v2  ;;  %v3668_v28 = vor.u32 %v4509_v20, %v3665_v21  ;;  %v4558_v53 = vld [vmem:[#allocation6 + $0x2e4] sm:$0xf]  ;;  %v4141_v63 = vld [vmem:[#allocation6 + $0x52c] sm:$0xf0] }
 0x24c   : > { %v1175_v50 = vmax.f32 %v1168_v36, 0.0  ;;  %v4502_v36 = vld [vmem:[#allocation6 + $0x124] sm:$0xf]  ;;  %v4195_v2 = vld [vmem:[#allocation6 + $0x580] sm:$0xf] }
 0x24d   : > { %v1178_v15 = vmax.f32 %v1142_v18, 0.0  ;;  %2735 = vmatpush.bf16.msrb.mxu1 %v3888_v12  ;;  %v4673_v12 = vld [vmem:[#allocation6 + $0x678] sm:$0xf0]  ;;  %v4684_v20 = vld [vmem:[#allocation6 + $0x6d4] sm:$0xf] }
 0x24e   : > { %2723 = vmatpush.bf16.msrb.mxu0 %v3608_v14  ;;  %v3696_v14 = vor.u32 %v4516_v6, %v3693_v7  ;;  %v4308_v19 = vor.u32 %v4673_v12, %v4307_v11  ;;  %v4645_v3 = vld [vmem:[#allocation6 + $0x598] sm:$0xf0]  ;;  %v3833_v6 = vld [vmem:[#allocation6 + $0x2c4] sm:$0xf0]  ;;  %v3584_v7 = vor.u32 %v4488_v59, %v3581_v61  ;;  %v3553_v11 = vld [vmem:[#allocation6 + $0x94] sm:$0xf0] }
 0x24f   : > { %v5044_v29 = vpack.c.bf16 %v1178_v15, %v1174_v24  ;;  %v1155_v30 = vpop.f32.mrf.mxu2  ;;  %v1169_v31 = vpop.f32.mrf.mxu3  ;;  %v4279_v24 = vld [vmem:[#allocation6 + $0x628] sm:$0xf]  ;;  %v4666_v15 = vld [vmem:[#allocation6 + $0x640] sm:$0xf0]  ;;  %v4621_v12 = vld [vmem:[#allocation6 + $0x4dc] sm:$0xf] }
 0x250   : > { %v1156_v37 = vadd.f32 %v1155_v30, %v735_v8  ;;  %v3747_v8 = vld [vmem:[#allocation6 + $0x200] sm:$0xf]  ;;  %v3999_v30 = vld [vmem:[#allocation6 + $0x3f8] sm:$0xf]  ;;  %v4280_v35 = vor.u32 %v4666_v15, %v4279_v24  ;;  %v4365_v21 = vld [vmem:[#allocation6 + $0x6ec] sm:$0xf0] }
 0x251   : > { %2736 = vmatpush.bf16.msrb.mxu1 %v3860_v25  ;;  %2644 = vmatmul.bf16.vlgmr.msrb.gmra.mxu2 %v5044_v29  ;;  %v3748_v18 = vor.u32 %v4533_v10, %v3747_v8  ;;  %v4028_v25 = vor.u32 %v4603_v17, %v4027_v16  ;;  %v4196_v10 = vor.u32 %v4645_v3, %v4195_v2  ;;  %v4167_v16 = vld [vmem:[#allocation6 + $0x548] sm:$0xf]  ;;  %v4638_v17 = vld [vmem:[#allocation6 + $0x560] sm:$0xf0]  ;;  %v3699_v43 = vld [vmem:[#allocation6 + $0x198] sm:$0xf] }
 0x252   : > { %v1170_v41 = vadd.f32 %v1169_v31, %v1156_v37  ;;  %2672 = vmatmul.bf16.vlgmr.msra.gmra.mxu0 %v5036_v44  ;;  %2748 = vmatpush.bf16.msrb.mxu2 %v4140_v26  ;;  %v4572_v26 = vld [vmem:[#allocation6 + $0x354] sm:$0xf]  ;;  %v3637_v37 = vld [vmem:[#allocation6 + $0x13c] sm:$0xf0]  ;;  %v4659_v31 = vld [vmem:[#allocation6 + $0x608] sm:$0xf0]  ;;  %v4168_v15 = vor.u32 %v4638_v17, %v4167_v16 }
 0x253   : > { %2724 = vmatpush.bf16.msrb.mxu0 %v3580_v33  ;;  %v4596_v33 = vld [vmem:[#allocation6 + $0x410] sm:$0xf0]  ;;  %v3920_v38 = vor.u32 %v4572_v26, %v3917_v27  ;;  %v4252_v46 = vor.u32 %v4659_v31, %v4251_v39  ;;  %v4474_v24 = vld [vmem:[#allocation6 + $0x44] sm:$0xf]  ;;  %v4085_v27 = vld [vmem:[#allocation6 + $0x4bc] sm:$0xf0] }
 0x254   : > { %v1179_v51 = vmax.f32 %v1170_v41, 0.0  ;;  %v3889_v41 = vld [vmem:[#allocation6 + $0x334] sm:$0xf0]  ;;  %v4614_v26 = vld [vmem:[#allocation6 + $0x4a4] sm:$0xf] }
 0x255   : > { %2737 = vmatpush.bf16.msrb.mxu1 %v3832_v40  ;;  %v4000_v40 = vor.u32 %v4596_v33, %v3999_v30  ;;  %v3892_v49 = vor.u32 %v4565_v32, %v3889_v41  ;;  %v4368_v30 = vor.u32 %v4684_v20, %v4365_v21  ;;  %v4537_v33 = vld [vmem:[#allocation6 + $0x23c] sm:$0xf]  ;;  %v4467_v39 = vld [vmem:[#allocation6 + $0xc] sm:$0xf]  ;;  %v3497_v31 = vld [vmem:[#allocation6 + $0x24] sm:$0xf0] }
 0x256   : > { %v5048_v57 = vpack.c.bf16 %v1179_v51, %v1175_v50  ;;  %2749 = vmatpush.bf16.msrb.mxu2 %v4112_v42  ;;  %v3640_v42 = vor.u32 %v4502_v36, %v3637_v37  ;;  %v4223_v50 = vld [vmem:[#allocation6 + $0x5b8] sm:$0xf]  ;;  %v4652_v51 = vld [vmem:[#allocation6 + $0x5d0] sm:$0xf0]  ;;  %v4057_v32 = vld [vmem:[#allocation6 + $0x484] sm:$0xf0] }
 0x257   : > { %2725 = vmatpush.bf16.msrb.mxu0 %v3552_v47  ;;  %v4495_v47 = vld [vmem:[#allocation6 + $0xec] sm:$0xf]  ;;  %v4224_v60 = vor.u32 %v4652_v51, %v4223_v50  ;;  %v4337_v36 = vld [vmem:[#allocation6 + $0x6b4] sm:$0xf0]  ;;  %v4520_v45 = vld [vmem:[#allocation6 + $0x1b0] sm:$0xf0]  ;;  %v3500_v50 = vor.u32 %v4467_v39, %v3497_v31 }
 0x258   : > { %2658 = vmatmul.bf16.vlgmr.msrb.gmra.mxu3 %v5048_v57  ;;  %2686 = vmatmul.bf16.vlgmr.msra.gmra.mxu1 %v5040_v0  ;;  %v4513_v59 = vld [vmem:[#allocation6 + $0x178] sm:$0xf0]  ;;  %v3721_v61 = vld [vmem:[#allocation6 + $0x1e4] sm:$0xf0]  ;;  %v3923_v2 = vld [vmem:[#allocation6 + $0x358] sm:$0xf] }
 0x259   : > { %2738 = vmatpush.bf16.msrb.mxu1 %v3804_v54  ;;  %2762 = vmatpush.bf16.msrb.mxu3 %v4364_v55  ;;  %v3861_v54 = vld [vmem:[#allocation6 + $0x2fc] sm:$0xf0]  ;;  %v3612_v55 = vor.u32 %v4495_v47, %v3609_v48  ;;  %v4670_v48 = vld [vmem:[#allocation6 + $0x664] sm:$0xf]  ;;  %v4576_v3 = vld [vmem:[#allocation6 + $0x370] sm:$0xf0] }
 0x25a   : > { %2750 = vmatpush.bf16.msrb.mxu2 %v4084_v58  ;;  %v4582_v58 = vld [vmem:[#allocation6 + $0x3a0] sm:$0xf0]  ;;  %v3864_v1 = vor.u32 %v4558_v53, %v3861_v54  ;;  %v3749_v47 = vld [vmem:[#allocation6 + $0x21c] sm:$0xf0]  ;;  %v4600_v53 = vld [vmem:[#allocation6 + $0x434] sm:$0xf] }
 0x25b   : > { %2726 = vmatpush.bf16.msrb.mxu0 %v3524_v62  ;;  %v4628_v62 = vld [vmem:[#allocation6 + $0x514] sm:$0xf]  ;;  %v4029_v54 = vld [vmem:[#allocation6 + $0x44c] sm:$0xf0]  ;;  %v3895_v16 = vld [vmem:[#allocation6 + $0x320] sm:$0xf] }
 0x25c   : > { %v4144_v8 = vor.u32 %v4628_v62, %v4141_v63  ;;  %v4663_v62 = vld [vmem:[#allocation6 + $0x62c] sm:$0xf]  ;;  %v4281_v63 = vld [vmem:[#allocation6 + $0x644] sm:$0xf0]  ;;  %v4569_v17 = vld [vmem:[#allocation6 + $0x338] sm:$0xf0] }
 0x25d   : > { %2739 = vmatpush.bf16.msrb.mxu1 %v3776_v4  ;;  %2763 = vmatpush.bf16.msrb.mxu3 %v4336_v5  ;;  %v3944_v4 = vor.u32 %v4582_v58, %v3943_v56  ;;  %v4551_v5 = vld [vmem:[#allocation6 + $0x2ac] sm:$0xf]  ;;  %v3671_v58 = vld [vmem:[#allocation6 + $0x160] sm:$0xf]  ;;  %v4632_v39 = vld [vmem:[#allocation6 + $0x530] sm:$0xf0] }
 0x25e   : > { %2751 = vmatpush.bf16.msrb.mxu2 %v4056_v9  ;;  %v4481_v9 = vld [vmem:[#allocation6 + $0x7c] sm:$0xf]  ;;  %v3973_v20 = vld [vmem:[#allocation6 + $0x3dc] sm:$0xf0] }
 0x25f   : > { %2727 = vmatpush.bf16.msrb.mxu0 %v3496_v13  ;;  %v4113_v13 = vld [vmem:[#allocation6 + $0x4f4] sm:$0xf0]  ;;  %v3556_v22 = vor.u32 %v4481_v9, %v3553_v11  ;;  %v3643_v9 = vld [vmem:[#allocation6 + $0x128] sm:$0xf]  ;;  %v3924_v11 = vor.u32 %v4576_v3, %v3923_v2 }
 0x260   : > { %v4116_v23 = vor.u32 %v4621_v12, %v4113_v13  ;;  %v4656_v12 = vld [vmem:[#allocation6 + $0x5f4] sm:$0xf]  ;;  %v4253_v13 = vld [vmem:[#allocation6 + $0x60c] sm:$0xf0] }
 0x261   : > { %2740 = vmatpush.bf16.msrb.mxu1 %v3748_v18  ;;  %2764 = vmatpush.bf16.msrb.mxu3 %v4308_v19  ;;  %v4544_v18 = vld [vmem:[#allocation6 + $0x274] sm:$0xf]  ;;  %v3805_v19 = vld [vmem:[#allocation6 + $0x28c] sm:$0xf0]  ;;  %v4256_v21 = vor.u32 %v4656_v12, %v4253_v13  ;;  %v4471_v13 = vld [vmem:[#allocation6 + $0x28] sm:$0xf0] }
 0x262   : > { %2700 = vmatmul.bf16.vlgmr.msra.gmra.mxu2 %v5044_v29  ;;  %2728 = vmatmul.bf16.vlgmr.msrb.gmra.mxu0 %v5036_v44 }
 0x263   : > { %2776 = vmatpush.bf16.msra.mxu0 %v3696_v14  ;;  %2752 = vmatpush.bf16.msrb.mxu2 %v4028_v25  ;;  %v3836_v14 = vor.u32 %v4551_v5, %v3833_v6  ;;  %v3525_v25 = vld [vmem:[#allocation6 + $0x5c] sm:$0xf0]  ;;  %v4593_v5 = vld [vmem:[#allocation6 + $0x3fc] sm:$0xf]  ;;  %v4001_v6 = vld [vmem:[#allocation6 + $0x414] sm:$0xf0] }
 0x264   : > { %v3528_v37 = vor.u32 %v4474_v24, %v3525_v25  ;;  %v3896_v24 = vor.u32 %v4569_v17, %v3895_v16  ;;  %v4225_v25 = vld [vmem:[#allocation6 + $0x5d4] sm:$0xf0]  ;;  %v4611_v16 = vld [vmem:[#allocation6 + $0x488] sm:$0xf0] }
 0x265   : > { %2741 = vmatpush.bf16.msrb.mxu1 %v3720_v34  ;;  %2765 = vmatpush.bf16.msrb.mxu3 %v4280_v35  ;;  %v3777_v34 = vld [vmem:[#allocation6 + $0x254] sm:$0xf0]  ;;  %v4677_v35 = vld [vmem:[#allocation6 + $0x69c] sm:$0xf] }
 0x266   : > { %v3780_v41 = vor.u32 %v4537_v33, %v3777_v34  ;;  %v4579_v33 = vld [vmem:[#allocation6 + $0x38c] sm:$0xf]  ;;  %v3945_v34 = vld [vmem:[#allocation6 + $0x3a4] sm:$0xf0] }
 0x267   : > { %2777 = vmatpush.bf16.msra.mxu0 %v3668_v28  ;;  %2753 = vmatpush.bf16.msrb.mxu2 %v4000_v40  ;;  %v3808_v28 = vor.u32 %v4544_v18, %v3805_v19  ;;  %v4607_v40 = vld [vmem:[#allocation6 + $0x46c] sm:$0xf]  ;;  %v4586_v19 = vld [vmem:[#allocation6 + $0x3c4] sm:$0xf] }
 0x268   : > { %2714 = vmatmul.bf16.vlgmr.msra.gmra.mxu3 %v5048_v57  ;;  %2742 = vmatmul.bf16.vlgmr.msrb.gmra.mxu1 %v5040_v0  ;;  %v4060_v51 = vor.u32 %v4607_v40, %v4057_v32  ;;  %v4642_v40 = vld [vmem:[#allocation6 + $0x584] sm:$0xf]  ;;  %v4197_v32 = vld [vmem:[#allocation6 + $0x59c] sm:$0xf0] }
 0x269   : > { %2790 = vmatpush.bf16.msra.mxu1 %v3920_v38  ;;  %2766 = vmatpush.bf16.msrb.mxu3 %v4252_v46  ;;  %v4088_v38 = vor.u32 %v4614_v26, %v4085_v27  ;;  %v4530_v46 = vld [vmem:[#allocation6 + $0x204] sm:$0xf]  ;;  %v3976_v26 = vor.u32 %v4586_v19, %v3973_v20  ;;  %v3867_v27 = vld [vmem:[#allocation6 + $0x2e8] sm:$0xf]  ;;  %v4517_v19 = vld [vmem:[#allocation6 + $0x19c] sm:$0xf] }
 0x26a   : > { %v3701_v20 = vld [vmem:[#allocation6 + $0x1b4] sm:$0xf0] }
 0x26b   : > { %2778 = vmatpush.bf16.msra.mxu0 %v3640_v42  ;;  %2754 = vmatpush.bf16.msrb.mxu2 %v3972_v52  ;;  %v4340_v42 = vor.u32 %v4677_v35, %v4337_v36  ;;  %v3700_v52 = vor.u32 %v4520_v45, %v3699_v43  ;;  %v3587_v35 = vld [vmem:[#allocation6 + $0xb8] sm:$0xf]  ;;  %v4555_v43 = vld [vmem:[#allocation6 + $0x2c8] sm:$0xf0] }
 0x26d   : > { %2791 = vmatpush.bf16.msra.mxu1 %v3892_v49  ;;  %2767 = vmatpush.bf16.msrb.mxu3 %v4224_v60  ;;  %v4309_v49 = vld [vmem:[#allocation6 + $0x67c] sm:$0xf0]  ;;  %v4523_v60 = vld [vmem:[#allocation6 + $0x1cc] sm:$0xf] }
 0x26e   : > { %v4312_v56 = vor.u32 %v4670_v48, %v4309_v49  ;;  %v4200_v48 = vor.u32 %v4642_v40, %v4197_v32  ;;  %v4485_v49 = vld [vmem:[#allocation6 + $0x98] sm:$0xf0]  ;;  %v3925_v40 = vld [vmem:[#allocation6 + $0x374] sm:$0xf0] }
 0x26f   : > { %2779 = vmatpush.bf16.msra.mxu0 %v3612_v55  ;;  %2755 = vmatpush.bf16.msrb.mxu2 %v3944_v4  ;;  %v3752_v55 = vor.u32 %v4530_v46, %v3749_v47  ;;  %v3672_v4 = vor.u32 %v4513_v59, %v3671_v58  ;;  %v3559_v47 = vld [vmem:[#allocation6 + $0x80] sm:$0xf]  ;;  %v4371_v58 = vld [vmem:[#allocation6 + $0x6d8] sm:$0xf]  ;;  %v4688_v59 = vld [vmem:[#allocation6 + $0x6f0] sm:$0xf0] }
 0x270   : > { %v4372_v3 = vor.u32 %v4688_v59, %v4371_v58  ;;  %v3979_v58 = vld [vmem:[#allocation6 + $0x3c8] sm:$0xf]  ;;  %v4590_v59 = vld [vmem:[#allocation6 + $0x3e0] sm:$0xf0] }
 0x271   : > { %2792 = vmatpush.bf16.msra.mxu1 %v3864_v1  ;;  %2768 = vmatpush.bf16.msrb.mxu3 %v4196_v10  ;;  %v4032_v1 = vor.u32 %v4600_v53, %v4029_v54  ;;  %v4506_v10 = vld [vmem:[#allocation6 + $0x140] sm:$0xf0]  ;;  %v4635_v53 = vld [vmem:[#allocation6 + $0x54c] sm:$0xf]  ;;  %v4169_v54 = vld [vmem:[#allocation6 + $0x564] sm:$0xf0] }
 0x272   : > { %2756 = vmatmul.bf16.vlgmr.msrb.gmra.mxu2 %v5044_v29  ;;  %v3644_v18 = vor.u32 %v4506_v10, %v3643_v9  ;;  %v4681_v9 = vld [vmem:[#allocation6 + $0x6b8] sm:$0xf0] }
 0x273   : > { %2780 = vmatpush.bf16.msra.mxu0 %v3584_v7  ;;  %2804 = vmatpush.bf16.msra.mxu2 %v4144_v8  ;;  %v3724_v7 = vor.u32 %v4523_v60, %v3721_v61  ;;  %v4284_v8 = vor.u32 %v4663_v62, %v4281_v63  ;;  %v3560_v60 = vor.u32 %v4485_v49, %v3559_v47  ;;  %v3531_v63 = vld [vmem:[#allocation6 + $0x48] sm:$0xf]  ;;  %v4503_v47 = vld [vmem:[#allocation6 + $0x12c] sm:$0xf] }
 0x274   : > { %v4172_v62 = vor.u32 %v4635_v53, %v4169_v54  ;;  %v3645_v49 = vld [vmem:[#allocation6 + $0x144] sm:$0xf0]  ;;  %v3897_v53 = vld [vmem:[#allocation6 + $0x33c] sm:$0xf0] }
 0x275   : > { %2793 = vmatpush.bf16.msra.mxu1 %v3836_v14  ;;  %2769 = vmatpush.bf16.msrb.mxu3 %v4168_v15  ;;  %v4004_v14 = vor.u32 %v4593_v5, %v4001_v6  ;;  %v4649_v15 = vld [vmem:[#allocation6 + $0x5bc] sm:$0xf]  ;;  %v4618_v5 = vld [vmem:[#allocation6 + $0x4c0] sm:$0xf0]  ;;  %v3783_v6 = vld [vmem:[#allocation6 + $0x240] sm:$0xf] }
 0x276   : > { %v4228_v36 = vor.u32 %v4649_v15, %v4225_v25 }
 0x277   : > { %2781 = vmatpush.bf16.msra.mxu0 %v3556_v22  ;;  %2805 = vmatpush.bf16.msra.mxu2 %v4116_v23  ;;  %v3615_v22 = vld [vmem:[#allocation6 + $0xf0] sm:$0xf]  ;;  %v4499_v23 = vld [vmem:[#allocation6 + $0x108] sm:$0xf0] }
 0x278   : > { %2770 = vmatmul.bf16.vlgmr.msrb.gmra.mxu3 %v5048_v57 }
 0x279   : > { %2794 = vmatpush.bf16.msra.mxu1 %v3808_v28  ;;  %2818 = vmatpush.bf16.msra.mxu3 %v4368_v30  ;;  %v4562_v28 = vld [vmem:[#allocation6 + $0x300] sm:$0xf0]  ;;  %v3616_v30 = vor.u32 %v4499_v23, %v3615_v22  ;;  %v4315_v23 = vld [vmem:[#allocation6 + $0x668] sm:$0xf] }
 0x27a   : > { %v3868_v31 = vor.u32 %v4562_v28, %v3867_v27  ;;  %v4534_v22 = vld [vmem:[#allocation6 + $0x220] sm:$0xf0]  ;;  %v4035_v27 = vld [vmem:[#allocation6 + $0x438] sm:$0xf]  ;;  %v4604_v28 = vld [vmem:[#allocation6 + $0x450] sm:$0xf0] }
 0x27b   : > { %2782 = vmatpush.bf16.msra.mxu0 %v3528_v37  ;;  %2806 = vmatpush.bf16.msra.mxu2 %v4088_v38  ;;  %v4492_v37 = vld [vmem:[#allocation6 + $0xd0] sm:$0xf0]  ;;  %v4147_v38 = vld [vmem:[#allocation6 + $0x518] sm:$0xf]  ;;  %v4036_v32 = vor.u32 %v4604_v28, %v4035_v27  ;;  %v4175_v27 = vld [vmem:[#allocation6 + $0x550] sm:$0xf] }
 0x27c   : > { %v3588_v45 = vor.u32 %v4492_v37, %v3587_v35  ;;  %v4148_v46 = vor.u32 %v4632_v39, %v4147_v38  ;;  %v3673_v35 = vld [vmem:[#allocation6 + $0x17c] sm:$0xf0]  ;;  %v4527_v37 = vld [vmem:[#allocation6 + $0x1e8] sm:$0xf0]  ;;  %v4287_v38 = vld [vmem:[#allocation6 + $0x630] sm:$0xf] }
 0x27d   : > { %2795 = vmatpush.bf16.msra.mxu1 %v3780_v41  ;;  %2819 = vmatpush.bf16.msra.mxu3 %v4340_v42  ;;  %v3948_v41 = vor.u32 %v4579_v33, %v3945_v34  ;;  %v3839_v42 = vld [vmem:[#allocation6 + $0x2b0] sm:$0xf]  ;;  %v4510_v34 = vld [vmem:[#allocation6 + $0x164] sm:$0xf]  ;;  %v4667_v39 = vld [vmem:[#allocation6 + $0x648] sm:$0xf0] }
 0x27e   : > { %v4639_v28 = vld [vmem:[#allocation6 + $0x568] sm:$0xf0] }
 0x27f   : > { %2783 = vmatpush.bf16.msra.mxu0 %v3500_v50  ;;  %2807 = vmatpush.bf16.msra.mxu2 %v4060_v51  ;;  %v4119_v50 = vld [vmem:[#allocation6 + $0x4e0] sm:$0xf]  ;;  %v4625_v51 = vld [vmem:[#allocation6 + $0x4f8] sm:$0xf0] }
 0x280   : > { %v4120_v61 = vor.u32 %v4625_v51, %v4119_v50  ;;  %v4259_v50 = vld [vmem:[#allocation6 + $0x5f8] sm:$0xf]  ;;  %v4660_v51 = vld [vmem:[#allocation6 + $0x610] sm:$0xf0] }
 0x281   : > { %2796 = vmatpush.bf16.msra.mxu1 %v3752_v55  ;;  %2820 = vmatpush.bf16.msra.mxu3 %v4312_v56  ;;  %v3811_v55 = vld [vmem:[#allocation6 + $0x278] sm:$0xf]  ;;  %v4548_v56 = vld [vmem:[#allocation6 + $0x290] sm:$0xf0] }
 0x282   : > { %2784 = vmatmul.bf16.vlgmr.msra.gmra.mxu0 %v5036_v44  ;;  %v3812_v2 = vor.u32 %v4548_v56, %v3811_v55  ;;  %v3648_v55 = vor.u32 %v4503_v47, %v3645_v49  ;;  %v4260_v56 = vor.u32 %v4660_v51, %v4259_v50  ;;  %v4345_v47 = vld [vmem:[#allocation6 + $0x6bc] sm:$0xf0]  ;;  %v4468_v49 = vld [vmem:[#allocation6 + $0x14] sm:$0xf] }
 0x283   : > { %2832 = vmatpush.bf16.msrb.mxu0 %v3700_v52  ;;  %2808 = vmatpush.bf16.msra.mxu2 %v4032_v1  ;;  %v3840_v52 = vor.u32 %v4555_v43, %v3839_v42  ;;  %v4478_v1 = vld [vmem:[#allocation6 + $0x60] sm:$0xf0]  ;;  %v4288_v43 = vor.u32 %v4667_v39, %v4287_v38  ;;  %v4176_v38 = vor.u32 %v4639_v28, %v4175_v27 }
 0x284   : > { %v3532_v10 = vor.u32 %v4478_v1, %v3531_v63  ;;  %v4231_v63 = vld [vmem:[#allocation6 + $0x5c0] sm:$0xf]  ;;  %v4653_v1 = vld [vmem:[#allocation6 + $0x5d8] sm:$0xf0]  ;;  %v4570_v27 = vld [vmem:[#allocation6 + $0x340] sm:$0xf0] }
 0x285   : > { %2797 = vmatpush.bf16.msra.mxu1 %v3724_v7  ;;  %2821 = vmatpush.bf16.msra.mxu3 %v4284_v8  ;;  %v4541_v7 = vld [vmem:[#allocation6 + $0x258] sm:$0xf0]  ;;  %v4343_v8 = vld [vmem:[#allocation6 + $0x6a0] sm:$0xf] }
 0x286   : > { %v3784_v17 = vor.u32 %v4541_v7, %v3783_v6  ;;  %v4232_v7 = vor.u32 %v4653_v1, %v4231_v63 }
 0x287   : > { %2833 = vmatpush.bf16.msrb.mxu0 %v3672_v4  ;;  %2809 = vmatpush.bf16.msra.mxu2 %v4004_v14  ;;  %v4091_v4 = vld [vmem:[#allocation6 + $0x4a8] sm:$0xf]  ;;  %v4063_v14 = vld [vmem:[#allocation6 + $0x470] sm:$0xf] }
 0x288   : > { %2798 = vmatmul.bf16.vlgmr.msra.gmra.mxu1 %v5040_v0  ;;  %v4092_v12 = vor.u32 %v4618_v5, %v4091_v4  ;;  %v4064_v25 = vor.u32 %v4611_v16, %v4063_v14  ;;  %v3980_v4 = vor.u32 %v4590_v59, %v3979_v58  ;;  %v3951_v5 = vld [vmem:[#allocation6 + $0x390] sm:$0xf]  ;;  %v4203_v14 = vld [vmem:[#allocation6 + $0x588] sm:$0xf]  ;;  %v4646_v16 = vld [vmem:[#allocation6 + $0x5a0] sm:$0xf0] }
 0x289   : > { %2846 = vmatpush.bf16.msrb.mxu1 %v3924_v11  ;;  %2822 = vmatpush.bf16.msra.mxu3 %v4256_v21  ;;  %v3503_v11 = vld [vmem:[#allocation6 + $0x10] sm:$0xf]  ;;  %v3755_v21 = vld [vmem:[#allocation6 + $0x208] sm:$0xf]  ;;  %v4521_v58 = vld [vmem:[#allocation6 + $0x1b8] sm:$0xf0] }
 0x28a   : > { %v3504_v15 = vor.u32 %v4471_v13, %v3503_v11  ;;  %v4149_v13 = vld [vmem:[#allocation6 + $0x534] sm:$0xf0]  ;;  %v4531_v59 = vld [vmem:[#allocation6 + $0x20c] sm:$0xf] }
 0x28b   : > { %2834 = vmatpush.bf16.msrb.mxu0 %v3644_v18  ;;  %2810 = vmatpush.bf16.msra.mxu2 %v3976_v26  ;;  %v4344_v18 = vor.u32 %v4681_v9, %v4343_v8  ;;  %v3704_v26 = vor.u32 %v4517_v19, %v3701_v20  ;;  %v4583_v8 = vld [vmem:[#allocation6 + $0x3a8] sm:$0xf0]  ;;  %v4489_v9 = vld [vmem:[#allocation6 + $0xbc] sm:$0xf] }
 0x28c   : > { %v3952_v19 = vor.u32 %v4583_v8, %v3951_v5  ;;  %v4514_v8 = vld [vmem:[#allocation6 + $0x180] sm:$0xf0] }
 0x28d   : > { %2847 = vmatpush.bf16.msrb.mxu1 %v3896_v24  ;;  %2823 = vmatpush.bf16.msra.mxu3 %v4228_v36  ;;  %v4674_v24 = vld [vmem:[#allocation6 + $0x680] sm:$0xf0]  ;;  %v3727_v36 = vld [vmem:[#allocation6 + $0x1d0] sm:$0xf] }
 0x28e   : > { %v4316_v33 = vor.u32 %v4674_v24, %v4315_v23  ;;  %v3728_v42 = vor.u32 %v4527_v37, %v3727_v36  ;;  %v3561_v23 = vld [vmem:[#allocation6 + $0x9c] sm:$0xf0]  ;;  %v4204_v24 = vor.u32 %v4646_v16, %v4203_v14  ;;  %v4577_v14 = vld [vmem:[#allocation6 + $0x378] sm:$0xf0] }
 0x28f   : > { %2835 = vmatpush.bf16.msrb.mxu0 %v3616_v30  ;;  %2811 = vmatpush.bf16.msra.mxu2 %v3948_v41  ;;  %v3756_v30 = vor.u32 %v4534_v22, %v3755_v21  ;;  %v3676_v41 = vor.u32 %v4510_v34, %v3673_v35  ;;  %v4482_v22 = vld [vmem:[#allocation6 + $0x84] sm:$0xf]  ;;  %v4685_v34 = vld [vmem:[#allocation6 + $0x6dc] sm:$0xf]  ;;  %v4373_v35 = vld [vmem:[#allocation6 + $0x6f4] sm:$0xf0] }
 0x290   : > { %v3564_v36 = vor.u32 %v4482_v22, %v3561_v23  ;;  %v3651_v22 = vld [vmem:[#allocation6 + $0x130] sm:$0xf] }
 0x291   : > { %2848 = vmatpush.bf16.msrb.mxu1 %v3868_v31  ;;  %2824 = vmatpush.bf16.msra.mxu3 %v4200_v48  ;;  %v4573_v31 = vld [vmem:[#allocation6 + $0x35c] sm:$0xf] }
 0x292   : > { %2812 = vmatmul.bf16.vlgmr.msra.gmra.mxu2 %v5044_v29  ;;  %v3928_v48 = vor.u32 %v4573_v31, %v3925_v40  ;;  %v4475_v31 = vld [vmem:[#allocation6 + $0x4c] sm:$0xf]  ;;  %v3533_v40 = vld [vmem:[#allocation6 + $0x64] sm:$0xf0] }
 0x293   : > { %2836 = vmatpush.bf16.msrb.mxu0 %v3588_v45  ;;  %2860 = vmatpush.bf16.msrb.mxu2 %v4148_v46  ;;  %v4007_v45 = vld [vmem:[#allocation6 + $0x400] sm:$0xf]  ;;  %v4597_v46 = vld [vmem:[#allocation6 + $0x418] sm:$0xf0] }
 0x294   : > { %v4008_v54 = vor.u32 %v4597_v46, %v4007_v45  ;;  %v3785_v45 = vld [vmem:[#allocation6 + $0x25c] sm:$0xf0]  ;;  %v4678_v46 = vld [vmem:[#allocation6 + $0x6a4] sm:$0xf] }
 0x295   : > { %2849 = vmatpush.bf16.msrb.mxu1 %v3840_v52  ;;  %2825 = vmatpush.bf16.msra.mxu3 %v4172_v62  ;;  %v4566_v52 = vld [vmem:[#allocation6 + $0x324] sm:$0xf]  ;;  %v3617_v62 = vld [vmem:[#allocation6 + $0x10c] sm:$0xf0] }
 0x297   : > { %2837 = vmatpush.bf16.msrb.mxu0 %v3560_v60  ;;  %2861 = vmatpush.bf16.msrb.mxu2 %v4120_v61  ;;  %v4496_v60 = vld [vmem:[#allocation6 + $0xf4] sm:$0xf]  ;;  %v3900_v61 = vor.u32 %v4566_v52, %v3897_v53  ;;  %v3505_v52 = vld [vmem:[#allocation6 + $0x2c] sm:$0xf0] }
 0x298   : > { %2826 = vmatmul.bf16.vlgmr.msra.gmra.mxu3 %v5048_v57  ;;  %v3620_v6 = vor.u32 %v4496_v60, %v3617_v62  ;;  %v4608_v53 = vld [vmem:[#allocation6 + $0x474] sm:$0xf]  ;;  %v3757_v60 = vld [vmem:[#allocation6 + $0x224] sm:$0xf0]  ;;  %v3508_v63 = vor.u32 %v4468_v49, %v3505_v52  ;;  %v4643_v52 = vld [vmem:[#allocation6 + $0x58c] sm:$0xf] }
 0x299   : > { %2850 = vmatpush.bf16.msrb.mxu1 %v3812_v2  ;;  %2874 = vmatpush.bf16.msrb.mxu3 %v4372_v3  ;;  %v4559_v2 = vld [vmem:[#allocation6 + $0x2ec] sm:$0xf]  ;;  %v3869_v3 = vld [vmem:[#allocation6 + $0x304] sm:$0xf0]  ;;  %v3760_v5 = vor.u32 %v4531_v59, %v3757_v60 }
 0x29a   : > { %v3872_v11 = vor.u32 %v4559_v2, %v3869_v3  ;;  %v4317_v62 = vld [vmem:[#allocation6 + $0x684] sm:$0xf0]  ;;  %v4601_v3 = vld [vmem:[#allocation6 + $0x43c] sm:$0xf] }
 0x29b   : > { %2838 = vmatpush.bf16.msrb.mxu0 %v3532_v10  ;;  %2862 = vmatpush.bf16.msrb.mxu2 %v4092_v12  ;;  %v3589_v10 = vld [vmem:[#allocation6 + $0xd4] sm:$0xf0]  ;;  %v4629_v12 = vld [vmem:[#allocation6 + $0x51c] sm:$0xf]  ;;  %v3567_v60 = vld [vmem:[#allocation6 + $0x88] sm:$0xf] }
 0x29c   : > { %v3592_v20 = vor.u32 %v4489_v9, %v3589_v10  ;;  %v4152_v21 = vor.u32 %v4629_v12, %v4149_v13  ;;  %v4524_v9 = vld [vmem:[#allocation6 + $0x1d4] sm:$0xf]  ;;  %v3729_v10 = vld [vmem:[#allocation6 + $0x1ec] sm:$0xf0]  ;;  %v3931_v13 = vld [vmem:[#allocation6 + $0x360] sm:$0xf] }
 0x29d   : > { %2851 = vmatpush.bf16.msrb.mxu1 %v3784_v17  ;;  %2875 = vmatpush.bf16.msrb.mxu3 %v4344_v18  ;;  %v4552_v17 = vld [vmem:[#allocation6 + $0x2b4] sm:$0xf]  ;;  %v3841_v18 = vld [vmem:[#allocation6 + $0x2cc] sm:$0xf0]  ;;  %v3932_v23 = vor.u32 %v4577_v14, %v3931_v13  ;;  %v4479_v14 = vld [vmem:[#allocation6 + $0x68] sm:$0xf0] }
 0x29e   : > { %v4289_v12 = vld [vmem:[#allocation6 + $0x64c] sm:$0xf0] }
 0x29f   : > { %2839 = vmatpush.bf16.msrb.mxu0 %v3504_v15  ;;  %2863 = vmatpush.bf16.msrb.mxu2 %v4064_v25  ;;  %v3844_v15 = vor.u32 %v4552_v17, %v3841_v18  ;;  %v4622_v25 = vld [vmem:[#allocation6 + $0x4e4] sm:$0xf]  ;;  %v3732_v18 = vor.u32 %v4524_v9, %v3729_v10  ;;  %v3539_v13 = vld [vmem:[#allocation6 + $0x50] sm:$0xf] }
 0x2a1   : > { %2852 = vmatpush.bf16.msrb.mxu1 %v3756_v30  ;;  %2876 = vmatpush.bf16.msrb.mxu3 %v4316_v33  ;;  %v4545_v30 = vld [vmem:[#allocation6 + $0x27c] sm:$0xf]  ;;  %v3813_v33 = vld [vmem:[#allocation6 + $0x294] sm:$0xf0] }
 0x2a2   : > { %2840 = vmatmul.bf16.vlgmr.msrb.gmra.mxu0 %v5036_v44  ;;  %v3816_v39 = vor.u32 %v4545_v30, %v3813_v33 }
 0x2a3   : > { %2888 = vmatpush.bf16.msra.mxu0 %v3704_v26  ;;  %2864 = vmatpush.bf16.msrb.mxu2 %v4036_v32  ;;  %v4121_v26 = vld [vmem:[#allocation6 + $0x4fc] sm:$0xf0]  ;;  %v4615_v32 = vld [vmem:[#allocation6 + $0x4ac] sm:$0xf] }
 0x2a4   : > { %v4124_v37 = vor.u32 %v4622_v25, %v4121_v26  ;;  %v4261_v25 = vld [vmem:[#allocation6 + $0x614] sm:$0xf0]  ;;  %v3903_v26 = vld [vmem:[#allocation6 + $0x328] sm:$0xf] }
 0x2a5   : > { %2853 = vmatpush.bf16.msrb.mxu1 %v3728_v42  ;;  %2877 = vmatpush.bf16.msrb.mxu3 %v4288_v43  ;;  %v4093_v42 = vld [vmem:[#allocation6 + $0x4c4] sm:$0xf0]  ;;  %v4538_v43 = vld [vmem:[#allocation6 + $0x244] sm:$0xf] }
 0x2a6   : > { %v4096_v50 = vor.u32 %v4615_v32, %v4093_v42  ;;  %v3788_v51 = vor.u32 %v4538_v43, %v3785_v45  ;;  %v4563_v32 = vld [vmem:[#allocation6 + $0x308] sm:$0xf0]  ;;  %v4580_v42 = vld [vmem:[#allocation6 + $0x394] sm:$0xf] }
 0x2a7   : > { %2889 = vmatpush.bf16.msra.mxu0 %v3676_v41  ;;  %2865 = vmatpush.bf16.msrb.mxu2 %v4008_v54  ;;  %v4376_v41 = vor.u32 %v4685_v34, %v4373_v35  ;;  %v4065_v54 = vld [vmem:[#allocation6 + $0x48c] sm:$0xf0]  ;;  %v4587_v34 = vld [vmem:[#allocation6 + $0x3cc] sm:$0xf]  ;;  %v3981_v35 = vld [vmem:[#allocation6 + $0x3e4] sm:$0xf0] }
 0x2a8   : > { %2854 = vmatmul.bf16.vlgmr.msrb.gmra.mxu1 %v5040_v0  ;;  %v4068_v1 = vor.u32 %v4608_v53, %v4065_v54  ;;  %v4205_v53 = vld [vmem:[#allocation6 + $0x5a4] sm:$0xf0]  ;;  %v3847_v54 = vld [vmem:[#allocation6 + $0x2b8] sm:$0xf] }
 0x2a9   : > { %2902 = vmatpush.bf16.msra.mxu1 %v3928_v48  ;;  %2878 = vmatpush.bf16.msrb.mxu3 %v4260_v56  ;;  %v3536_v48 = vor.u32 %v4475_v31, %v3533_v40  ;;  %v3707_v56 = vld [vmem:[#allocation6 + $0x1a0] sm:$0xf]  ;;  %v3875_v40 = vld [vmem:[#allocation6 + $0x2f0] sm:$0xf] }
 0x2aa   : > { %v3708_v2 = vor.u32 %v4521_v58, %v3707_v56  ;;  %v4233_v31 = vld [vmem:[#allocation6 + $0x5dc] sm:$0xf0]  ;;  %v3876_v49 = vor.u32 %v4563_v32, %v3875_v40 }
 0x2ab   : > { %2890 = vmatpush.bf16.msra.mxu0 %v3648_v55  ;;  %2866 = vmatpush.bf16.msrb.mxu2 %v3980_v4  ;;  %v4348_v55 = vor.u32 %v4678_v46, %v4345_v47  ;;  %v4037_v4 = vld [vmem:[#allocation6 + $0x454] sm:$0xf0]  ;;  %v3953_v46 = vld [vmem:[#allocation6 + $0x3ac] sm:$0xf0]  ;;  %v3595_v47 = vld [vmem:[#allocation6 + $0xc0] sm:$0xf] }
 0x2ac   : > { %v4040_v16 = vor.u32 %v4601_v3, %v4037_v4  ;;  %v3956_v56 = vor.u32 %v4580_v42, %v3953_v46  ;;  %v4636_v3 = vld [vmem:[#allocation6 + $0x554] sm:$0xf]  ;;  %v4177_v4 = vld [vmem:[#allocation6 + $0x56c] sm:$0xf0]  ;;  %v4043_v32 = vld [vmem:[#allocation6 + $0x440] sm:$0xf] }
 0x2ad   : > { %2903 = vmatpush.bf16.msra.mxu1 %v3900_v61  ;;  %2879 = vmatpush.bf16.msrb.mxu3 %v4232_v7  ;;  %v4671_v61 = vld [vmem:[#allocation6 + $0x66c] sm:$0xf]  ;;  %v3679_v7 = vld [vmem:[#allocation6 + $0x168] sm:$0xf]  ;;  %v4605_v42 = vld [vmem:[#allocation6 + $0x458] sm:$0xf0] }
 0x2ae   : > { %v3680_v17 = vor.u32 %v4514_v8, %v3679_v7  ;;  %v4379_v7 = vld [vmem:[#allocation6 + $0x6e0] sm:$0xf]  ;;  %v4689_v8 = vld [vmem:[#allocation6 + $0x6f8] sm:$0xf0] }
 0x2af   : > { %2891 = vmatpush.bf16.msra.mxu0 %v3620_v6  ;;  %2867 = vmatpush.bf16.msrb.mxu2 %v3952_v19  ;;  %v4320_v6 = vor.u32 %v4671_v61, %v4317_v62  ;;  %v4486_v61 = vld [vmem:[#allocation6 + $0xa0] sm:$0xf0]  ;;  %v4208_v62 = vor.u32 %v4643_v52, %v4205_v53  ;;  %v4015_v53 = vld [vmem:[#allocation6 + $0x408] sm:$0xf] }
 0x2b0   : > { %v3568_v9 = vor.u32 %v4486_v61, %v3567_v60 }
 0x2b1   : > { %2904 = vmatpush.bf16.msra.mxu1 %v3872_v11  ;;  %2880 = vmatpush.bf16.msrb.mxu3 %v4204_v24  ;;  %v4664_v11 = vld [vmem:[#allocation6 + $0x634] sm:$0xf]  ;;  %v4507_v24 = vld [vmem:[#allocation6 + $0x148] sm:$0xf0] }
 0x2b2   : > { %2868 = vmatmul.bf16.vlgmr.msrb.gmra.mxu2 %v5044_v29  ;;  %v4292_v19 = vor.u32 %v4664_v11, %v4289_v12  ;;  %v3652_v30 = vor.u32 %v4507_v24, %v3651_v22  ;;  %v4180_v11 = vor.u32 %v4636_v3, %v4177_v4  ;;  %v4682_v22 = vld [vmem:[#allocation6 + $0x6c0] sm:$0xf0]  ;;  %v3540_v24 = vor.u32 %v4479_v14, %v3539_v13  ;;  %v4239_v3 = vld [vmem:[#allocation6 + $0x5c8] sm:$0xf] }
 0x2b3   : > { %2892 = vmatpush.bf16.msra.mxu0 %v3592_v20  ;;  %2916 = vmatpush.bf16.msra.mxu2 %v4152_v21  ;;  %v4594_v20 = vld [vmem:[#allocation6 + $0x404] sm:$0xf]  ;;  %v4009_v21 = vld [vmem:[#allocation6 + $0x41c] sm:$0xf0] }
 0x2b4   : > { %v4012_v28 = vor.u32 %v4594_v20, %v4009_v21  ;;  %v4542_v20 = vld [vmem:[#allocation6 + $0x260] sm:$0xf0]  ;;  %v4351_v21 = vld [vmem:[#allocation6 + $0x6a8] sm:$0xf] }
 0x2b5   : > { %2905 = vmatpush.bf16.msra.mxu1 %v3844_v15  ;;  %2881 = vmatpush.bf16.msrb.mxu3 %v4176_v38  ;;  %v4657_v15 = vld [vmem:[#allocation6 + $0x5fc] sm:$0xf]  ;;  %v4500_v38 = vld [vmem:[#allocation6 + $0x110] sm:$0xf0]  ;;  %v4654_v4 = vld [vmem:[#allocation6 + $0x5e0] sm:$0xf0] }
 0x2b6   : > { %v4264_v33 = vor.u32 %v4657_v15, %v4261_v25 }
 0x2b7   : > { %2893 = vmatpush.bf16.msra.mxu0 %v3564_v36  ;;  %2917 = vmatpush.bf16.msra.mxu2 %v4124_v37  ;;  %v3623_v36 = vld [vmem:[#allocation6 + $0xf8] sm:$0xf]  ;;  %v3904_v37 = vor.u32 %v4570_v27, %v3903_v26  ;;  %v4472_v27 = vld [vmem:[#allocation6 + $0x30] sm:$0xf0] }
 0x2b8   : > { %2882 = vmatmul.bf16.vlgmr.msrb.gmra.mxu3 %v5048_v57  ;;  %v3624_v43 = vor.u32 %v4500_v38, %v3623_v36  ;;  %v3511_v26 = vld [vmem:[#allocation6 + $0x18] sm:$0xf]  ;;  %v4535_v36 = vld [vmem:[#allocation6 + $0x228] sm:$0xf0] }
 0x2b9   : > { %2906 = vmatpush.bf16.msra.mxu1 %v3816_v39  ;;  %2930 = vmatpush.bf16.msra.mxu3 %v4376_v41  ;;  %v4650_v39 = vld [vmem:[#allocation6 + $0x5c4] sm:$0xf]  ;;  %v3984_v41 = vor.u32 %v4587_v34, %v3981_v35  ;;  %v4612_v34 = vld [vmem:[#allocation6 + $0x490] sm:$0xf0]  ;;  %v3763_v35 = vld [vmem:[#allocation6 + $0x210] sm:$0xf] }
 0x2ba   : > { %v4236_v45 = vor.u32 %v4650_v39, %v4233_v31  ;;  %v4675_v38 = vld [vmem:[#allocation6 + $0x688] sm:$0xf0]  ;;  %v3512_v39 = vor.u32 %v4472_v27, %v3511_v26  ;;  %v3764_v40 = vor.u32 %v4535_v36, %v3763_v35 }
 0x2bb   : > { %2894 = vmatpush.bf16.msra.mxu0 %v3536_v48  ;;  %2918 = vmatpush.bf16.msra.mxu2 %v4096_v50  ;;  %v4493_v48 = vld [vmem:[#allocation6 + $0xd8] sm:$0xf0]  ;;  %v4155_v50 = vld [vmem:[#allocation6 + $0x520] sm:$0xf] }
 0x2bc   : > { %v3596_v58 = vor.u32 %v4493_v48, %v3595_v47  ;;  %v4295_v47 = vld [vmem:[#allocation6 + $0x638] sm:$0xf]  ;;  %v4668_v48 = vld [vmem:[#allocation6 + $0x650] sm:$0xf0] }
 0x2bd   : > { %2907 = vmatpush.bf16.msra.mxu1 %v3788_v51  ;;  %2931 = vmatpush.bf16.msra.mxu3 %v4348_v55  ;;  %v4633_v51 = vld [vmem:[#allocation6 + $0x538] sm:$0xf0]  ;;  %v4556_v55 = vld [vmem:[#allocation6 + $0x2d0] sm:$0xf0]  ;;  %v4296_v52 = vor.u32 %v4668_v48, %v4295_v47 }
 0x2be   : > { %v4156_v59 = vor.u32 %v4633_v51, %v4155_v50 }
 0x2bf   : > { %2895 = vmatpush.bf16.msra.mxu0 %v3508_v63  ;;  %2919 = vmatpush.bf16.msra.mxu2 %v4068_v1  ;;  %v3848_v63 = vor.u32 %v4556_v55, %v3847_v54  ;;  %v4127_v1 = vld [vmem:[#allocation6 + $0x4e8] sm:$0xf]  ;;  %v4598_v54 = vld [vmem:[#allocation6 + $0x420] sm:$0xf0]  ;;  %v4267_v55 = vld [vmem:[#allocation6 + $0x600] sm:$0xf] }
 0x2c1   : > { %2908 = vmatpush.bf16.msra.mxu1 %v3760_v5  ;;  %2932 = vmatpush.bf16.msra.mxu3 %v4320_v6  ;;  %v3819_v5 = vld [vmem:[#allocation6 + $0x280] sm:$0xf]  ;;  %v4549_v6 = vld [vmem:[#allocation6 + $0x298] sm:$0xf0] }
 0x2c2   : > { %2896 = vmatmul.bf16.vlgmr.msra.gmra.mxu0 %v5036_v44  ;;  %v3820_v12 = vor.u32 %v4549_v6, %v3819_v5  ;;  %v4240_v6 = vor.u32 %v4654_v4, %v4239_v3 }
 0x2c3   : > { %2944 = vmatpush.bf16.msrb.mxu0 %v3708_v2  ;;  %2920 = vmatpush.bf16.msra.mxu2 %v4040_v16  ;;  %v4626_v2 = vld [vmem:[#allocation6 + $0x500] sm:$0xf0]  ;;  %v4099_v16 = vld [vmem:[#allocation6 + $0x4b0] sm:$0xf] }
 0x2c4   : > { %v4128_v10 = vor.u32 %v4626_v2, %v4127_v1  ;;  %v5078_v1 = vld [vmem:[%s5118_s9] sm:$0xff] }
 0x2c5   : > { %2909 = vmatpush.bf16.msra.mxu1 %v3732_v18  ;;  %2933 = vmatpush.bf16.msra.mxu3 %v4292_v19  ;;  %v4619_v18 = vld [vmem:[#allocation6 + $0x4c8] sm:$0xf0]  ;;  %v3791_v19 = vld [vmem:[#allocation6 + $0x248] sm:$0xf]  ;;  %v1442_v5 = vperm.slane %v5078_v1, 0 }
 0x2c6   : > { %v4100_v15 = vor.u32 %v4619_v18, %v4099_v16  ;;  %v3792_v25 = vor.u32 %v4542_v20, %v3791_v19  ;;  %v4183_v18 = vld [vmem:[#allocation6 + $0x558] sm:$0xf]  ;;  %v4640_v19 = vld [vmem:[#allocation6 + $0x570] sm:$0xf0] }
 0x2c7   : > { %2945 = vmatpush.bf16.msrb.mxu0 %v3680_v17  ;;  %2921 = vmatpush.bf16.msra.mxu2 %v4012_v28  ;;  %v4380_v17 = vor.u32 %v4689_v8, %v4379_v7  ;;  %v4071_v28 = vld [vmem:[#allocation6 + $0x478] sm:$0xf]  ;;  %v4584_v8 = vld [vmem:[#allocation6 + $0x3b0] sm:$0xf0] }
 0x2c8   : > { %2910 = vmatmul.bf16.vlgmr.msra.gmra.mxu1 %v5040_v0  ;;  %v4072_v31 = vor.u32 %v4612_v34, %v4071_v28  ;;  %v3959_v7 = vld [vmem:[#allocation6 + $0x398] sm:$0xf] }
 0x2c9   : > { %2958 = vmatpush.bf16.msrb.mxu1 %v3932_v23  ;;  %2934 = vmatpush.bf16.msra.mxu3 %v4264_v33  ;;  %v5069_v23 = vpop.f32.mrf.mxu0  ;;  %v4352_v33 = vor.u32 %v4682_v22, %v4351_v21  ;;  %v3960_v13 = vor.u32 %v4584_v8, %v3959_v7 }
 0x2ca   : > { %v2618_v14 = vadd.f32 %v5069_v23, %v1442_v5 }
 0x2cb   : > { %2946 = vmatpush.bf16.msrb.mxu0 %v3652_v30  ;;  %2922 = vmatpush.bf16.msra.mxu2 %v3984_v41  ;;  %v5071_v30 = vpop.f32.mrf.mxu1 }
 0x2cc   : > { %v2632_v20 = vadd.f32 %v5071_v30, %v2618_v14 }
 0x2cd   : > { %2959 = vmatpush.bf16.msrb.mxu1 %v3904_v37  ;;  %2935 = vmatpush.bf16.msra.mxu3 %v4236_v45  ;;  %v4323_v37 = vld [vmem:[#allocation6 + $0x670] sm:$0xf]  ;;  %v4528_v45 = vld [vmem:[#allocation6 + $0x1f0] sm:$0xf0] }
 0x2ce   : > { %v4324_v41 = vor.u32 %v4675_v38, %v4323_v37 }
 0x2cf   : > { %2947 = vmatpush.bf16.msrb.mxu0 %v3624_v43  ;;  %2923 = vmatpush.bf16.msra.mxu2 %v3956_v56  ;;  %v3735_v43 = vld [vmem:[#allocation6 + $0x1d8] sm:$0xf]  ;;  %v4661_v56 = vld [vmem:[#allocation6 + $0x618] sm:$0xf0] }
 0x2d0   : > { %v3736_v50 = vor.u32 %v4528_v45, %v3735_v43  ;;  %v4268_v61 = vor.u32 %v4661_v56, %v4267_v55  ;;  %v1445_v56 = vperm.slane %v5078_v1, 3 }
 0x2d1   : > { %2960 = vmatpush.bf16.msrb.mxu1 %v3876_v49  ;;  %2936 = vmatpush.bf16.msra.mxu3 %v4208_v62  ;;  %v4044_v49 = vor.u32 %v4605_v42, %v4043_v32  ;;  %v2619_v51 = vpop.f32.mrf.mxu0  ;;  %v3987_v62 = vld [vmem:[#allocation6 + $0x3d0] sm:$0xf] }
 0x2d2   : > { %2924 = vmatmul.bf16.vlgmr.msra.gmra.mxu2 %v5044_v29  ;;  %v2620_v27 = vadd.f32 %v2619_v51, %v1442_v5 }
 0x2d3   : > { %2948 = vmatpush.bf16.msrb.mxu0 %v3596_v58  ;;  %2972 = vmatpush.bf16.msrb.mxu2 %v4156_v59  ;;  %v2633_v58 = vpop.f32.mrf.mxu1  ;;  %v4016_v59 = vor.u32 %v4598_v54, %v4015_v53  ;;  %v1444_v54 = vperm.slane %v5078_v1, 2 }
 0x2d4   : > { %v2645_v46 = vpop.f32.mrf.mxu2  ;;  %v2634_v35 = vadd.f32 %v2633_v58, %v2620_v27 }
 0x2d5   : > { %2961 = vmatpush.bf16.msrb.mxu1 %v3848_v63  ;;  %2937 = vmatpush.bf16.msra.mxu3 %v4180_v11  ;;  %v4591_v63 = vld [vmem:[#allocation6 + $0x3e8] sm:$0xf0] }
 0x2d7   : > { %2949 = vmatpush.bf16.msrb.mxu0 %v3568_v9  ;;  %2973 = vmatpush.bf16.msrb.mxu2 %v4128_v10  ;;  %v4211_v9 = vld [vmem:[#allocation6 + $0x590] sm:$0xf]  ;;  %v4647_v10 = vld [vmem:[#allocation6 + $0x5a8] sm:$0xf0] }
 0x2d8   : > { %2938 = vmatmul.bf16.vlgmr.msra.gmra.mxu3 %v5048_v57 }
 0x2d9   : > { %2962 = vmatpush.bf16.msrb.mxu1 %v3820_v12  ;;  %2986 = vmatpush.bf16.msrb.mxu3 %v4380_v17  ;;  %v2673_v11 = vpop.f32.mrf.mxu0  ;;  %v1443_v12 = vperm.slane %v5078_v1, 1  ;;  %v4212_v17 = vor.u32 %v4647_v10, %v4211_v9 }
 0x2db   : > { %2950 = vmatpush.bf16.msrb.mxu0 %v3540_v24  ;;  %2974 = vmatpush.bf16.msrb.mxu2 %v4100_v15  ;;  %v2659_v60 = vpop.f32.mrf.mxu3  ;;  %v2687_v16 = vpop.f32.mrf.mxu1  ;;  %v2674_v22 = vadd.f32 %v2673_v11, %v1443_v12  ;;  %v2646_v24 = vadd.f32 %v2645_v46, %v2632_v20  ;;  %v4184_v15 = vor.u32 %v4640_v19, %v4183_v18 }
 0x2dc   : > { %v2647_v2 = vpop.f32.mrf.mxu2 }
 0x2dd   : > { %2963 = vmatpush.bf16.msrb.mxu1 %v3792_v25  ;;  %2987 = vmatpush.bf16.msrb.mxu3 %v4352_v33  ;;  %v2688_v25 = vadd.f32 %v2687_v16, %v2674_v22  ;;  %v2660_v26 = vadd.f32 %v2659_v60, %v2646_v24  ;;  %v2648_v37 = vadd.f32 %v2647_v2, %v2634_v35  ;;  %v1446_v35 = vperm.slane %v5078_v1, 4 }
 0x2df   : > { %2951 = vmatpush.bf16.msrb.mxu0 %v3512_v39  ;;  %2975 = vmatpush.bf16.msrb.mxu2 %v4072_v31  ;;  %4739 = vtanh.f32 %v2660_v26 }
 0x2e1   : > { %2964 = vmatpush.bf16.msrb.mxu1 %v3764_v40  ;;  %2988 = vmatpush.bf16.msrb.mxu3 %v4324_v41  ;;  %v2675_v28 = vpop.f32.mrf.mxu0 }
 0x2e2   : > { %2952 = vmatmul.bf16.vlgmr.msrb.gmra.mxu0 %v5036_v44  ;;  %v3988_v44 = vor.u32 %v4591_v63, %v3987_v62  ;;  %v2676_v36 = vadd.f32 %v2675_v28, %v1443_v12 }
 0x2e3   : > { %2976 = vmatpush.bf16.msrb.mxu2 %v4044_v49  ;;  %v2689_v30 = vpop.f32.mrf.mxu1 }
 0x2e4   : > { %v2690_v39 = vadd.f32 %v2689_v30, %v2676_v36  ;;  %v1447_v36 = vperm.slane %v5078_v1, 5 }
 0x2e5   : > { %2965 = vmatpush.bf16.msrb.mxu1 %v3736_v50  ;;  %2989 = vmatpush.bf16.msrb.mxu3 %v4296_v52  ;;  %v2701_v21 = vpop.f32.mrf.mxu2 }
 0x2e6   : > { %v2702_v23 = vadd.f32 %v2701_v21, %v2688_v25 }
 0x2e7   : > { %2977 = vmatpush.bf16.msrb.mxu2 %v4016_v59 }
 0x2e8   : > { %2966 = vmatmul.bf16.vlgmr.msrb.gmra.mxu1 %v5040_v0  ;;  %v2661_v0 = vpop.f32.mrf.mxu3 }
 0x2e9   : > { %2990 = vmatpush.bf16.msrb.mxu3 %v4268_v61  ;;  %v2662_v31 = vadd.f32 %v2661_v0, %v2648_v37  ;;  %v2729_v46 = vpop.f32.mrf.mxu0 }
 0x2ea   : > { %v2730_v58 = vadd.f32 %v2729_v46, %v1444_v54 }
 0x2eb   : > { %2978 = vmatpush.bf16.msrb.mxu2 %v3988_v44  ;;  %v2743_v48 = vpop.f32.mrf.mxu1 }
 0x2ec   : > { %v2744_v61 = vadd.f32 %v2743_v48, %v2730_v58 }
 0x2ed   : > { %2991 = vmatpush.bf16.msrb.mxu3 %v4240_v6  ;;  %v2703_v38 = vpop.f32.mrf.mxu2 }
 0x2ee   : > { %v2704_v40 = vadd.f32 %v2703_v38, %v2690_v39 }
 0x2ef   : > { %2979 = vmatpush.bf16.msrb.mxu2 %v3960_v13 }
 0x2f0   : > { %v2715_v33 = vpop.f32.mrf.mxu3 }
 0x2f1   : > { %2992 = vmatpush.bf16.msrb.mxu3 %v4212_v17  ;;  %v2716_v34 = vadd.f32 %v2715_v33, %v2702_v23  ;;  %v2731_v50 = vpop.f32.mrf.mxu0 }
 0x2f2   : > { %2980 = vmatmul.bf16.vlgmr.msrb.gmra.mxu2 %v5044_v29  ;;  %v4740_v29 = vpop.eup %4739  ;;  %v2732_v5 = vadd.f32 %v2731_v50, %v1444_v54 }
 0x2f3   : > { %4741 = vtanh.f32 %v2716_v34  ;;  %v2745_v52 = vpop.f32.mrf.mxu1 }
 0x2f4   : > { %4743 = vtanh.f32 %v2662_v31  ;;  %v2746_v9 = vadd.f32 %v2745_v52, %v2732_v5 }
 0x2f5   : > { %2993 = vmatpush.bf16.msrb.mxu3 %v4184_v15  ;;  %v2757_v49 = vpop.f32.mrf.mxu2 }
 0x2f6   : > { %v2758_v2 = vadd.f32 %v2757_v49, %v2744_v61 }
 0x2f8   : > { %2994 = vmatmul.bf16.vlgmr.msrb.gmra.mxu3 %v5048_v57  ;;  %v2717_v32 = vpop.f32.mrf.mxu3 }
 0x2f9   : > { %v4742_v41 = vpop.eup %4741  ;;  %v2718_v42 = vadd.f32 %v2717_v32, %v2704_v40 }
 0x2fa   : > { %v3014_v43 = vpack.c.bf16 %v4742_v41, %v4740_v29  ;;  %v4744_v57 = vpop.eup %4743 }
 0x2fb   : > { %4745 = vtanh.f32 %v2718_v42 }
 0x2fc   : > { %3022 = vst [vmem:[%s5091_s28] sm:$0xff] %v3014_v43 }
 0x2fd   : > { %v2759_v53 = vpop.f32.mrf.mxu2 }
 0x2fe   : > { %v2760_v12 = vadd.f32 %v2759_v53, %v2746_v9 }
 0x2ff   : > { %v2785_v55 = vpop.f32.mrf.mxu0 }
 0x300   : > { %v2771_v51 = vpop.f32.mrf.mxu3  ;;  %v2786_v63 = vadd.f32 %v2785_v55, %v1445_v56 }
 0x301   : > { %v4746_v45 = vpop.eup %4745  ;;  %v2772_v4 = vadd.f32 %v2771_v51, %v2758_v2 }
 0x302   : > { %v3018_v47 = vpack.c.bf16 %v4746_v45, %v4744_v57 }
 0x303   : > { %4747 = vtanh.f32 %v2772_v4  ;;  %v1448_v4 = vperm.slane %v5078_v1, 6 }
 0x304   : > { %3026 = vst [vmem:[%s5091_s28 + $0x1c] sm:$0xff] %v3018_v47 }
 0x305   : > { %v2799_v59 = vpop.f32.mrf.mxu1 }
 0x306   : > { %v2800_v3 = vadd.f32 %v2799_v59, %v2786_v63 }
 0x307   : > { %v2787_v6 = vpop.f32.mrf.mxu0 }
 0x308   : > { %v2773_v60 = vpop.f32.mrf.mxu3  ;;  %v2788_v11 = vadd.f32 %v2787_v6, %v1445_v56 }
 0x309   : > { %v2774_v16 = vadd.f32 %v2773_v60, %v2760_v12  ;;  %v4748_v17 = vpop.eup %4747 }
 0x30d   : > { %v2801_v10 = vpop.f32.mrf.mxu1 }
 0x30e   : > { %v2802_v14 = vadd.f32 %v2801_v10, %v2788_v11 }
 0x315   : > { %v2813_v62 = vpop.f32.mrf.mxu2 }
 0x316   : > { %v2814_v44 = vadd.f32 %v2813_v62, %v2800_v3 }
 0x31b   : > { %v2827_v7 = vpop.f32.mrf.mxu3 }
 0x31c   : > { %v2828_v8 = vadd.f32 %v2827_v7, %v2814_v44 }
 0x31d   : > { %v2815_v13 = vpop.f32.mrf.mxu2 }
 0x31e   : > { %4749 = vtanh.f32 %v2828_v8  ;;  %v2816_v0 = vadd.f32 %v2815_v13, %v2802_v14 }
 0x31f   : > { %4751 = vtanh.f32 %v2774_v16  ;;  %v2841_v25 = vpop.f32.mrf.mxu0 }
 0x320   : > { %v2842_v37 = vadd.f32 %v2841_v25, %v1446_v35 }
 0x323   : > { %v2829_v18 = vpop.f32.mrf.mxu3 }
 0x324   : > { %v4750_v19 = vpop.eup %4749  ;;  %v2830_v20 = vadd.f32 %v2829_v18, %v2816_v0 }
 0x325   : > { %v3015_v21 = vpack.c.bf16 %v4750_v19, %v4748_v17  ;;  %v4752_v22 = vpop.eup %4751  ;;  %v2855_v26 = vpop.f32.mrf.mxu1 }
 0x326   : > { %4753 = vtanh.f32 %v2830_v20  ;;  %v2856_v31 = vadd.f32 %v2855_v26, %v2842_v37 }
 0x327   : > { %3023 = vst [vmem:[%s5091_s28 + $0x8] sm:$0xff] %v3015_v21  ;;  %v2843_v27 = vpop.f32.mrf.mxu0 }
 0x328   : > { %v2844_v57 = vadd.f32 %v2843_v27, %v1446_v35 }
 0x32c   : > { %v4754_v24 = vpop.eup %4753 }
 0x32d   : > { %v3019_v15 = vpack.c.bf16 %v4754_v24, %v4752_v22  ;;  %v2857_v33 = vpop.f32.mrf.mxu1 }
 0x32e   : > { %v2858_v48 = vadd.f32 %v2857_v33, %v2844_v57 }
 0x32f   : > { %3027 = vst [vmem:[%s5091_s28 + $0x24] sm:$0xff] %v3019_v15 }
 0x335   : > { %v2869_v23 = vpop.f32.mrf.mxu2 }
 0x336   : > { %v2870_v32 = vadd.f32 %v2869_v23, %v2856_v31 }
 0x33b   : > { %v2883_v28 = vpop.f32.mrf.mxu3 }
 0x33c   : > { %v2884_v42 = vadd.f32 %v2883_v28, %v2870_v32 }
 0x33d   : > { %v2871_v34 = vpop.f32.mrf.mxu2 }
 0x33e   : > { %4755 = vtanh.f32 %v2884_v42  ;;  %v2872_v51 = vadd.f32 %v2871_v34, %v2858_v48 }
 0x33f   : > { %v2897_v30 = vpop.f32.mrf.mxu0 }
 0x340   : > { %v2898_v29 = vadd.f32 %v2897_v30, %v1447_v36 }
 0x343   : > { %v2885_v39 = vpop.f32.mrf.mxu3 }
 0x344   : > { %v2886_v54 = vadd.f32 %v2885_v39, %v2872_v51  ;;  %v4756_v56 = vpop.eup %4755 }
 0x345   : > { %v2911_v38 = vpop.f32.mrf.mxu1 }
 0x346   : > { %v2912_v41 = vadd.f32 %v2911_v38, %v2898_v29 }
 0x347   : > { %v2899_v45 = vpop.f32.mrf.mxu0 }
 0x348   : > { %v2900_v50 = vadd.f32 %v2899_v45, %v1447_v36 }
 0x34d   : > { %v2913_v49 = vpop.f32.mrf.mxu1 }
 0x34e   : > { %v2914_v53 = vadd.f32 %v2913_v49, %v2900_v50 }
 0x355   : > { %v2925_v40 = vpop.f32.mrf.mxu2 }
 0x356   : > { %v2926_v43 = vadd.f32 %v2925_v40, %v2912_v41 }
 0x35b   : > { %v2939_v46 = vpop.f32.mrf.mxu3 }
 0x35c   : > { %v2940_v47 = vadd.f32 %v2939_v46, %v2926_v43 }
 0x35d   : > { %v2927_v52 = vpop.f32.mrf.mxu2 }
 0x35e   : > { %4757 = vtanh.f32 %v2940_v47  ;;  %v2928_v55 = vadd.f32 %v2927_v52, %v2914_v53 }
 0x35f   : > { %4759 = vtanh.f32 %v2886_v54  ;;  %v2953_v3 = vpop.f32.mrf.mxu0 }
 0x360   : > { %v2954_v5 = vadd.f32 %v2953_v3, %v1448_v4 }
 0x363   : > { %v2941_v58 = vpop.f32.mrf.mxu3 }
 0x364   : > { %v4758_v59 = vpop.eup %4757  ;;  %v2942_v60 = vadd.f32 %v2941_v58, %v2928_v55 }
 0x365   : > { %v3016_v61 = vpack.c.bf16 %v4758_v59, %v4756_v56  ;;  %v4760_v62 = vpop.eup %4759  ;;  %v2967_v44 = vpop.f32.mrf.mxu1 }
 0x366   : > { %4761 = vtanh.f32 %v2942_v60  ;;  %v2968_v7 = vadd.f32 %v2967_v44, %v2954_v5 }
 0x367   : > { %3024 = vst [vmem:[%s5091_s28 + $0x10] sm:$0xff] %v3016_v61  ;;  %v2955_v9 = vpop.f32.mrf.mxu0 }
 0x368   : > { %v2956_v13 = vadd.f32 %v2955_v9, %v1448_v4 }
 0x36c   : > { %v4762_v63 = vpop.eup %4761 }
 0x36d   : > { %v3020_v2 = vpack.c.bf16 %v4762_v63, %v4760_v62  ;;  %v2969_v12 = vpop.f32.mrf.mxu1 }
 0x36e   : > { %v2970_v16 = vadd.f32 %v2969_v12, %v2956_v13 }
 0x36f   : > { %3028 = vst [vmem:[%s5091_s28 + $0x2c] sm:$0xff] %v3020_v2 }
 0x375   : > { %v2981_v6 = vpop.f32.mrf.mxu2 }
 0x376   : > { %v2982_v8 = vadd.f32 %v2981_v6, %v2968_v7 }
 0x37b   : > { %v2995_v10 = vpop.f32.mrf.mxu3 }
 0x37c   : > { %v2996_v11 = vadd.f32 %v2995_v10, %v2982_v8 }
 0x37d   : > { %v2983_v14 = vpop.f32.mrf.mxu2 }
 0x37e   : > { %4763 = vtanh.f32 %v2996_v11  ;;  %v2984_v0 = vadd.f32 %v2983_v14, %v2970_v16 }
 0x383   : > { %v2997_v17 = vpop.f32.mrf.mxu3 }
 0x384   : > { %v4764_v18 = vpop.eup %4763  ;;  %v2998_v1 = vadd.f32 %v2997_v17, %v2984_v0 }
 0x385   : > { %v3017_v19 = vpack.c.bf16 %v4764_v18, %v4764_v18 }
 0x386   : > { %4765 = vtanh.f32 %v2998_v1 }
 0x387   : > { %3025 = vst [vmem:[%s5091_s28 + $0x18] sm:$0xf] %v3017_v19 }
 0x38c   : > { %v4766_v20 = vpop.eup %4765 }
 0x38d   : > { %v3021_v21 = vpack.c.bf16 %v4766_v20, %v4766_v20 }
 0x38f   : > { %3029 = vst [vmem:[%s5091_s28 + $0x34] sm:$0xf] %v3021_v21 }
 0x390 PF: > { %s22_s13 = sadd.s32 1, %s4871_s13  }
 0x391   : > { %p19_p7 = scmp.ge.s32.totalorder %s22_s13, 4  }
 0x393   :  { %21 = sbr.rel (!%p19_p7) target bundleno = 2 (0x2), region = 106 }
 0x398   :  { %3054 = vsyncpa [#allocation3], 1 }
 0x399   :  { %3056 = vsyncpa [#allocation3 + $0x1], 1 }
 0x39a   :  { %3057 = vsyncpa [#allocation5], 1 }

</bundles_post_ra>
